<compile_context>
chip_gen: v7x
topology: tpu7x:2x2x1
jax: 0.10.0
libtpu: 0.0.40
codegen_flags: <defaults>
</compile_context>

<pallas_src>
import jax
import jax.numpy as jnp
from jax.experimental import pallas as pl
from jax.experimental.pallas import tpu as pltpu


def _round_up(n, m):
    return ((n + m - 1) // m) * m


_BATCH_PAD = 8  # one f32 sublane tile


# ----------------------- fused LSTM-stack + MLP-head kernel -----------------------
def _make_fused_kernel(T, BP, L, GB, KC):
    """T: seq len, BP: padded batch (8), L: layers, GB: gate-block lane width (128),
    KC: compact contraction rows (max(input, hidden) rounded up to 16)."""

    def kernel(x_ref, wih_ref, whh_ref, b_ref,
               fc1w_ref, fc1b_ref, fcw_ref, fcb_ref,
               out_ref, seq_sc, pre_sc, hn_sc):
        # x_ref:    (T*BP, GB)   f32   time-major, lane/sublane-padded input
        # wih_ref:  (1, KC, 4GB) bf16  current layer's W_ih^T, gates [i|f|o|g]
        # whh_ref:  (1, KC, 4GB) bf16  current layer's W_hh^T
        # b_ref:    (1, 1, 4GB)  f32   b_ih + b_hh
        # fc1w/fc1b/fcw/fcb: f32 MLP head weights (lane padded)
        # out_ref:  (L*BP, CP)   f32   padded logits
        # seq_sc:   (T*BP, GB)   f32   hidden sequence of the current layer
        # pre_sc:   (T*BP, 4GB)  f32   hoisted input projection (per layer)
        # hn_sc:    (L, BP, GB)  f32   final hidden state of every layer
        layer = pl.program_id(0)

        # Layer 0 reads the input; later layers read the previous layer's output.
        # Seeding seq_sc with x lets the rest of the body be layer-agnostic; the
        # hoisted projection consumes seq_sc entirely before the time loop
        # overwrites it, so the in-place reuse is safe.
        @pl.when(layer == 0)
        def _():
            seq_sc[...] = x_ref[...]

        # Hoisted input projection + fused bias: one matmul per layer, off the
        # serial path.  bf16 operands, f32 accumulation.
        inp = seq_sc[:, :KC].astype(jnp.bfloat16)                   # (T*BP, KC)
        pre_sc[...] = (jnp.dot(inp, wih_ref[0],
                               preferred_element_type=jnp.float32)
                       + b_ref[0])                                   # (T*BP, 4GB)

        whh = whh_ref[0]                                             # (KC, 4GB) bf16
        h = jnp.zeros((BP, GB), jnp.float32)
        c = jnp.zeros((BP, GB), jnp.float32)

        # Time recurrence, fully unrolled (static T). Only h @ W_hh^T + gate math
        # is serial; each step loads one (8, 4GB) slice of pre_sc and stores one
        # full (8,128) tile of h.
        for t in range(T):
            gates = pre_sc[t * BP:(t + 1) * BP, :] + jnp.dot(
                h[:, :KC].astype(jnp.bfloat16), whh,
                preferred_element_type=jnp.float32)                  # (BP, 4GB)
            sig = jax.nn.sigmoid(gates[:, :3 * GB])   # [i|f|o] in one EUP sweep
            i_g = sig[:, 0 * GB:1 * GB]
            f_g = sig[:, 1 * GB:2 * GB]
            o_g = sig[:, 2 * GB:3 * GB]
            g_g = jnp.tanh(gates[:, 3 * GB:4 * GB])
            c = f_g * c + i_g * g_g
            h = o_g * jnp.tanh(c)
            seq_sc[t * BP:(t + 1) * BP, :] = h
        hn_sc[layer] = h

        # MLP head (last grid step only): ReLU -> fc1 -> ReLU -> fc, kept f32.
        @pl.when(layer == L - 1)
        def _():
            y = jnp.maximum(hn_sc[...].reshape(L * BP, GB), 0.0)
            y = jnp.maximum(
                jnp.dot(y, fc1w_ref[...], preferred_element_type=jnp.float32)
                + fc1b_ref[...], 0.0)
            out_ref[...] = (jnp.dot(y, fcw_ref[...],
                                    preferred_element_type=jnp.float32)
                            + fcb_ref[...])

    return kernel


# ------------------------------ weight pre-packing -------------------------------
def pack_params(params, num_classes, input_size, hidden_size, num_layers):
    """Transpose / fuse-bias / pad all weights once (not per forward call).

    Only the lane (last) dim is padded to 128; the contraction rows are padded
    to 16 (bf16 sublane tile), and the LSTM weights are stored as bf16.
    Gate lane-block order is [i|f|o|g] (PyTorch order is [i|f|g|o])."""
    H, L = hidden_size, num_layers
    GB = _round_up(H, 128)                                  # gate block lane width
    KC = _round_up(max(input_size, hidden_size), 16)        # compact K rows
    F1 = params["fc1_w"].shape[0]
    F1P = _round_up(F1, 128)
    CP = _round_up(num_classes, 128)

    gate_order = (0, 1, 3, 2)   # dest block d <- PyTorch gate gate_order[d]

    wih = jnp.zeros((L, KC, 4 * GB), jnp.float32)
    whh = jnp.zeros((L, KC, 4 * GB), jnp.float32)
    b = jnp.zeros((L, 1, 4 * GB), jnp.float32)
    for l in range(L):
        w_ih, w_hh, b_ih, b_hh = params["lstm"][l]
        in_dim = w_ih.shape[1]
        bias = b_ih + b_hh
        for d, s in enumerate(gate_order):
            wih = wih.at[l, :in_dim, d * GB:d * GB + H].set(w_ih[s * H:(s + 1) * H, :].T)
            whh = whh.at[l, :H, d * GB:d * GB + H].set(w_hh[s * H:(s + 1) * H, :].T)
            b = b.at[l, 0, d * GB:d * GB + H].set(bias[s * H:(s + 1) * H])

    fc1w = jnp.zeros((GB, F1P), jnp.float32).at[:H, :F1].set(params["fc1_w"].T)
    fc1b = jnp.zeros((1, F1P), jnp.float32).at[0, :F1].set(params["fc1_b"])
    fcw = jnp.zeros((F1P, CP), jnp.float32).at[:F1, :num_classes].set(params["fc_w"].T)
    fcb = jnp.zeros((1, CP), jnp.float32).at[0, :num_classes].set(params["fc_b"])

    return {"wih": wih.astype(jnp.bfloat16), "whh": whh.astype(jnp.bfloat16),
            "b": b, "fc1w": fc1w, "fc1b": fc1b, "fcw": fcw, "fcb": fcb,
            "num_layers": L, "gate_block": GB, "kc": KC, "num_classes": num_classes}


# --------------------------------- full forward -----------------------------------
def lstm_model_forward(x, packed):
    """x: (batch, seq, input_size) — PyTorch batch_first layout."""
    B, T, D = x.shape
    L = packed["num_layers"]
    GB = packed["gate_block"]
    KC = packed["kc"]
    C = packed["num_classes"]
    F1P = packed["fc1b"].shape[1]
    CP = packed["fcb"].shape[1]
    BP = _round_up(max(B, _BATCH_PAD), _BATCH_PAD)   # sublane-padded batch

    # time-major, batch padded to a full sublane tile, lane padded to GB
    x_tm = jnp.transpose(x, (1, 0, 2))                               # (T, B, D)
    x_pad = jnp.zeros((T, BP, GB), jnp.float32).at[:, :B, :D].set(x_tm)
    x_pad = x_pad.reshape(T * BP, GB)

    kernel = _make_fused_kernel(T, BP, L, GB, KC)
    out_pad = pl.pallas_call(
        kernel,
        out_shape=jax.ShapeDtypeStruct((L * BP, CP), jnp.float32),
        grid_spec=pltpu.PrefetchScalarGridSpec(
            num_scalar_prefetch=0,
            grid=(L,),
            in_specs=[
                pl.BlockSpec((T * BP, GB), lambda l: (0, 0)),        # x (fetched once)
                pl.BlockSpec((1, KC, 4 * GB), lambda l: (l, 0, 0)),  # W_ih^T  (per layer)
                pl.BlockSpec((1, KC, 4 * GB), lambda l: (l, 0, 0)),  # W_hh^T  (per layer)
                pl.BlockSpec((1, 1, 4 * GB), lambda l: (l, 0, 0)),   # bias    (per layer)
                pl.BlockSpec((GB, F1P), lambda l: (0, 0)),           # fc1 W^T
                pl.BlockSpec((1, F1P), lambda l: (0, 0)),            # fc1 b
                pl.BlockSpec((F1P, CP), lambda l: (0, 0)),           # fc  W^T
                pl.BlockSpec((1, CP), lambda l: (0, 0)),             # fc  b
            ],
            out_specs=pl.BlockSpec((L * BP, CP), lambda l: (0, 0)),
            scratch_shapes=[
                pltpu.VMEM((T * BP, GB), jnp.float32),      # per-layer hidden sequence
                pltpu.VMEM((T * BP, 4 * GB), jnp.float32),  # hoisted projection
                pltpu.VMEM((L, BP, GB), jnp.float32),       # final hidden per layer
            ]),
        compiler_params=pltpu.CompilerParams(
            dimension_semantics=("arbitrary",)),             # layers are serial
    )(x_pad, packed["wih"], packed["whh"], packed["b"],
      packed["fc1w"], packed["fc1b"], packed["fcw"], packed["fcb"])

    # Strip batch/lane padding; row order matches PyTorch hn.view(-1, H).
    return out_pad.reshape(L, BP, CP)[:, :B, :C].reshape(L * B, C)
    # TODO(synk): for scaled-up batch on v7x, add a leading "parallel" batch-chunk
    # grid axis (two TensorCores) and budget VMEM against 64 MiB with an explicit
    # vmem_limit_bytes / T-chunked seq scratch; unnecessary at these shapes.


# ------------------------------ pure-JAX reference ---------------------------------
def reference_forward(x, params, num_layers, hidden_size):
    B = x.shape[0]
    inp = x
    hns = []
    for layer in range(num_layers):
        w_ih, w_hh, b_ih, b_hh = params["lstm"][layer]
        h = jnp.zeros((B, hidden_size), jnp.float32)
        c = jnp.zeros((B, hidden_size), jnp.float32)
        outs = []
        for t in range(inp.shape[1]):
            x_t = inp[:, t, :]
            gates = x_t @ w_ih.T + b_ih + h @ w_hh.T + b_hh
            i, f, g, o = jnp.split(gates, 4, axis=1)
            i, f, g, o = (jax.nn.sigmoid(i), jax.nn.sigmoid(f),
                          jnp.tanh(g), jax.nn.sigmoid(o))
            c = f * c + i * g
            h = o * jnp.tanh(c)
            outs.append(h)
        inp = jnp.stack(outs, axis=1)
        hns.append(h)
    hn = jnp.concatenate(hns, axis=0)
    out = jnp.maximum(hn, 0.0)
    out = jnp.maximum(out @ params["fc1_w"].T + params["fc1_b"], 0.0)
    return out @ params["fc_w"].T + params["fc_b"]


# ------------------------------ param construction ---------------------------------
def init_params(key, num_classes, input_size, hidden_size, num_layers):
    params = {"lstm": []}
    k = 1.0 / jnp.sqrt(hidden_size)
    keys = jax.random.split(key, num_layers * 4 + 4)
    ki = 0
    for layer in range(num_layers):
        in_dim = input_size if layer == 0 else hidden_size
        w_ih = jax.random.uniform(keys[ki], (4 * hidden_size, in_dim),
                                  jnp.float32, -k, k); ki += 1
        w_hh = jax.random.uniform(keys[ki], (4 * hidden_size, hidden_size),
                                  jnp.float32, -k, k); ki += 1
        b_ih = jax.random.uniform(keys[ki], (4 * hidden_size,),
                                  jnp.float32, -k, k); ki += 1
        b_hh = jax.random.uniform(keys[ki], (4 * hidden_size,),
                                  jnp.float32, -k, k); ki += 1
        params["lstm"].append((w_ih, w_hh, b_ih, b_hh))
    k1 = 1.0 / jnp.sqrt(hidden_size)
    params["fc1_w"] = jax.random.uniform(keys[ki], (128, hidden_size),
                                         jnp.float32, -k1, k1); ki += 1
    params["fc1_b"] = jax.random.uniform(keys[ki], (128,),
                                         jnp.float32, -k1, k1); ki += 1
    k2 = 1.0 / jnp.sqrt(128.0)
    params["fc_w"] = jax.random.uniform(keys[ki], (num_classes, 128),
                                        jnp.float32, -k2, k2); ki += 1
    params["fc_b"] = jax.random.uniform(keys[ki], (num_classes,),
                                        jnp.float32, -k2, k2); ki += 1
    return params


if __name__ == "__main__":
    num_classes, input_size, hidden_size, num_layers, seq_length = 5, 4, 32, 2, 8
    batch = 2

    key = jax.random.PRNGKey(0)
    pkey, xkey = jax.random.split(key)
    params = init_params(pkey, num_classes, input_size, hidden_size, num_layers)
    x = jax.random.normal(xkey, (batch, seq_length, input_size), jnp.float32)

    packed = pack_params(params, num_classes, input_size, hidden_size, num_layers)
    out = lstm_model_forward(x, packed)
    out = jax.block_until_ready(out)

    ref = reference_forward(x, params, num_layers, hidden_size)
    assert out.shape == (num_layers * batch, num_classes), out.shape
    # bf16 matmul operands on the recurrent path (f32 accumulation): 2e-2 tolerance.
    # Switching the two recurrent dots back to f32 operands restores 1e-5 matching.
    assert jnp.allclose(out, ref, atol=2e-2, rtol=2e-2), (
        f"mismatch: max abs err {jnp.max(jnp.abs(out - ref))}")

    print("KERNEL_OK")
</pallas_src>

<mosaic_0001>
module attributes {stable_mosaic.version = 11 : i64} {
  func.func @kernel(%arg0: i32, %arg1: memref<64x128xf32, #tpu.memory_space<vmem>>, %arg2: memref<1x32x512xbf16, #tpu.memory_space<vmem>>, %arg3: memref<1x32x512xbf16, #tpu.memory_space<vmem>>, %arg4: memref<1x1x512xf32, #tpu.memory_space<vmem>>, %arg5: memref<128x128xf32, #tpu.memory_space<vmem>>, %arg6: memref<1x128xf32, #tpu.memory_space<vmem>>, %arg7: memref<128x128xf32, #tpu.memory_space<vmem>>, %arg8: memref<1x128xf32, #tpu.memory_space<vmem>>, %arg9: memref<16x128xf32, #tpu.memory_space<vmem>>, %arg10: memref<64x128xf32, #tpu.memory_space<vmem>>, %arg11: memref<64x512xf32, #tpu.memory_space<vmem>>, %arg12: memref<2x8x128xf32, #tpu.memory_space<vmem>>) attributes {dimension_semantics = [#tpu.dimension_semantics<arbitrary>], iteration_bounds = array<i64: 2>, scalar_prefetch = 0 : i64, scratch_operands = 3 : i64, tpu.core_type = #tpu.core_type<tc>, window_params = [{pipeline_mode = #tpu.pipeline_mode<synchronous>, transform_indices = @transform_0, window_bounds = array<i64: 64, 128>}, {transform_indices = @transform_1, window_bounds = array<i64: 1, 32, 512>}, {transform_indices = @transform_2, window_bounds = array<i64: 1, 32, 512>}, {transform_indices = @transform_3, window_bounds = array<i64: 1, 1, 512>}, {pipeline_mode = #tpu.pipeline_mode<synchronous>, transform_indices = @transform_4, window_bounds = array<i64: 128, 128>}, {pipeline_mode = #tpu.pipeline_mode<synchronous>, transform_indices = @transform_5, window_bounds = array<i64: 1, 128>}, {pipeline_mode = #tpu.pipeline_mode<synchronous>, transform_indices = @transform_6, window_bounds = array<i64: 128, 128>}, {pipeline_mode = #tpu.pipeline_mode<synchronous>, transform_indices = @transform_7, window_bounds = array<i64: 1, 128>}, {pipeline_mode = #tpu.pipeline_mode<synchronous>, transform_indices = @transform_8, window_bounds = array<i64: 16, 128>}]} {
    %c0_i32 = arith.constant 0 : i32
    %0 = arith.cmpi eq, %arg0, %c0_i32 : i32
    %1 = arith.extui %0 : i1 to i32
    %c0_i32_0 = arith.constant 0 : i32
    %2 = arith.cmpi ne, %1, %c0_i32_0 : i32
    scf.if %2 {
      %c0_59 = arith.constant 0 : index
      %c0_60 = arith.constant 0 : index
      %200 = vector.load %arg1[%c0_59, %c0_60] : memref<64x128xf32, #tpu.memory_space<vmem>>, vector<64x128xf32>
      %c0_61 = arith.constant 0 : index
      %c0_62 = arith.constant 0 : index
      %201 = vector.load %arg10[%c0_61, %c0_62] : memref<64x128xf32, #tpu.memory_space<vmem>>, vector<64x128xf32>
      tpu.vector_store %arg10[%c0_61, %c0_62], %200 {strides = array<i32>} : memref<64x128xf32, #tpu.memory_space<vmem>>, vector<64x128xf32>,
    } else {
    }
    %c0 = arith.constant 0 : index
    %c0_1 = arith.constant 0 : index
    %3 = vector.load %arg10[%c0, %c0_1] : memref<64x128xf32, #tpu.memory_space<vmem>>, vector<64x32xf32>
    %4 = arith.truncf %3 : vector<64x32xf32> to vector<64x32xbf16>
    %c0_2 = arith.constant 0 : index
    %c0_3 = arith.constant 0 : index
    %c0_4 = arith.constant 0 : index
    %5 = vector.load %arg2[%c0_2, %c0_3, %c0_4] : memref<1x32x512xbf16, #tpu.memory_space<vmem>>, vector<1x32x512xbf16>
    %6 = vector.shape_cast %5 : vector<1x32x512xbf16> to vector<32x512xbf16>
    %cst = arith.constant dense<0.000000e+00> : vector<64x512xf32>
    %7 = tpu.matmul %4, %6, %cst {dimension_numbers = #tpu.dot_dimension_numbers<[1], [0], [0], [1], [0, 0, 1, 1], [], []>} : vector<64x32xbf16>, vector<32x512xbf16>, vector<64x512xf32> -> vector<64x512xf32>
    %c0_5 = arith.constant 0 : index
    %c0_6 = arith.constant 0 : index
    %c0_7 = arith.constant 0 : index
    %8 = vector.load %arg4[%c0_5, %c0_6, %c0_7] : memref<1x1x512xf32, #tpu.memory_space<vmem>>, vector<1x1x512xf32>
    %9 = vector.shape_cast %8 : vector<1x1x512xf32> to vector<1x512xf32>
    %10 = vector.broadcast %9 : vector<1x512xf32> to vector<64x512xf32>
    %11 = arith.addf %7, %10 : vector<64x512xf32>
    %c0_8 = arith.constant 0 : index
    %c0_9 = arith.constant 0 : index
    %12 = vector.load %arg11[%c0_8, %c0_9] : memref<64x512xf32, #tpu.memory_space<vmem>>, vector<64x512xf32>
    tpu.vector_store %arg11[%c0_8, %c0_9], %11 {strides = array<i32>} : memref<64x512xf32, #tpu.memory_space<vmem>>, vector<64x512xf32>,
    %c0_10 = arith.constant 0 : index
    %c0_11 = arith.constant 0 : index
    %c0_12 = arith.constant 0 : index
    %13 = vector.load %arg3[%c0_10, %c0_11, %c0_12] : memref<1x32x512xbf16, #tpu.memory_space<vmem>>, vector<1x32x512xbf16>
    %14 = vector.shape_cast %13 : vector<1x32x512xbf16> to vector<32x512xbf16>
    %cst_13 = arith.constant 0.000000e+00 : f32
    %15 = vector.broadcast %cst_13 : f32 to vector<8x128xf32>
    %cst_14 = arith.constant 0.000000e+00 : f32
    %16 = vector.broadcast %cst_14 : f32 to vector<8x128xf32>
    %c0_15 = arith.constant 0 : index
    %c0_16 = arith.constant 0 : index
    %17 = vector.load %arg11[%c0_15, %c0_16] : memref<64x512xf32, #tpu.memory_space<vmem>>, vector<8x512xf32>
    %18 = vector.extract_strided_slice %15 {offsets = [0, 0], sizes = [8, 32], strides = [1, 1]} : vector<8x128xf32> to vector<8x32xf32>
    %19 = arith.truncf %18 : vector<8x32xf32> to vector<8x32xbf16>
    %cst_17 = arith.constant dense<0.000000e+00> : vector<8x512xf32>
    %20 = tpu.matmul %19, %14, %cst_17 {dimension_numbers = #tpu.dot_dimension_numbers<[1], [0], [0], [1], [0, 0, 1, 1], [], []>} : vector<8x32xbf16>, vector<32x512xbf16>, vector<8x512xf32> -> vector<8x512xf32>
    %21 = arith.addf %17, %20 : vector<8x512xf32>
    %22 = vector.extract_strided_slice %21 {offsets = [0, 0], sizes = [8, 384], strides = [1, 1]} : vector<8x512xf32> to vector<8x384xf32>
    %23 = arith.negf %22 : vector<8x384xf32>
    %24 = math.exp %23 : vector<8x384xf32>
    %cst_18 = arith.constant 1.000000e+00 : f32
    %25 = vector.broadcast %cst_18 : f32 to vector<8x384xf32>
    %26 = arith.addf %25, %24 : vector<8x384xf32>
    %27 = arith.divf %25, %26 : vector<8x384xf32>
    %28 = vector.extract_strided_slice %27 {offsets = [0, 0], sizes = [8, 128], strides = [1, 1]} : vector<8x384xf32> to vector<8x128xf32>
    %29 = vector.extract_strided_slice %27 {offsets = [0, 128], sizes = [8, 128], strides = [1, 1]} : vector<8x384xf32> to vector<8x128xf32>
    %30 = vector.extract_strided_slice %27 {offsets = [0, 256], sizes = [8, 128], strides = [1, 1]} : vector<8x384xf32> to vector<8x128xf32>
    %31 = vector.extract_strided_slice %21 {offsets = [0, 384], sizes = [8, 128], strides = [1, 1]} : vector<8x512xf32> to vector<8x128xf32>
    %32 = math.tanh %31 : vector<8x128xf32>
    %33 = arith.mulf %29, %16 : vector<8x128xf32>
    %34 = arith.mulf %28, %32 : vector<8x128xf32>
    %35 = arith.addf %33, %34 : vector<8x128xf32>
    %36 = math.tanh %35 : vector<8x128xf32>
    %37 = arith.mulf %30, %36 : vector<8x128xf32>
    %c0_19 = arith.constant 0 : index
    %c0_20 = arith.constant 0 : index
    %38 = vector.load %arg10[%c0_19, %c0_20] : memref<64x128xf32, #tpu.memory_space<vmem>>, vector<8x128xf32>
    tpu.vector_store %arg10[%c0_19, %c0_20], %37 {strides = array<i32>} : memref<64x128xf32, #tpu.memory_space<vmem>>, vector<8x128xf32>,
    %c8 = arith.constant 8 : index
    %c0_21 = arith.constant 0 : index
    %39 = vector.load %arg11[%c8, %c0_21] : memref<64x512xf32, #tpu.memory_space<vmem>>, vector<8x512xf32>
    %40 = vector.extract_strided_slice %37 {offsets = [0, 0], sizes = [8, 32], strides = [1, 1]} : vector<8x128xf32> to vector<8x32xf32>
    %41 = arith.truncf %40 : vector<8x32xf32> to vector<8x32xbf16>
    %cst_22 = arith.constant dense<0.000000e+00> : vector<8x512xf32>
    %42 = tpu.matmul %41, %14, %cst_22 {dimension_numbers = #tpu.dot_dimension_numbers<[1], [0], [0], [1], [0, 0, 1, 1], [], []>} : vector<8x32xbf16>, vector<32x512xbf16>, vector<8x512xf32> -> vector<8x512xf32>
    %43 = arith.addf %39, %42 : vector<8x512xf32>
    %44 = vector.extract_strided_slice %43 {offsets = [0, 0], sizes = [8, 384], strides = [1, 1]} : vector<8x512xf32> to vector<8x384xf32>
    %45 = arith.negf %44 : vector<8x384xf32>
    %46 = math.exp %45 : vector<8x384xf32>
    %cst_23 = arith.constant 1.000000e+00 : f32
    %47 = vector.broadcast %cst_23 : f32 to vector<8x384xf32>
    %48 = arith.addf %47, %46 : vector<8x384xf32>
    %49 = arith.divf %47, %48 : vector<8x384xf32>
    %50 = vector.extract_strided_slice %49 {offsets = [0, 0], sizes = [8, 128], strides = [1, 1]} : vector<8x384xf32> to vector<8x128xf32>
    %51 = vector.extract_strided_slice %49 {offsets = [0, 128], sizes = [8, 128], strides = [1, 1]} : vector<8x384xf32> to vector<8x128xf32>
    %52 = vector.extract_strided_slice %49 {offsets = [0, 256], sizes = [8, 128], strides = [1, 1]} : vector<8x384xf32> to vector<8x128xf32>
    %53 = vector.extract_strided_slice %43 {offsets = [0, 384], sizes = [8, 128], strides = [1, 1]} : vector<8x512xf32> to vector<8x128xf32>
    %54 = math.tanh %53 : vector<8x128xf32>
    %55 = arith.mulf %51, %35 : vector<8x128xf32>
    %56 = arith.mulf %50, %54 : vector<8x128xf32>
    %57 = arith.addf %55, %56 : vector<8x128xf32>
    %58 = math.tanh %57 : vector<8x128xf32>
    %59 = arith.mulf %52, %58 : vector<8x128xf32>
    %c8_24 = arith.constant 8 : index
    %c0_25 = arith.constant 0 : index
    %60 = vector.load %arg10[%c8_24, %c0_25] : memref<64x128xf32, #tpu.memory_space<vmem>>, vector<8x128xf32>
    tpu.vector_store %arg10[%c8_24, %c0_25], %59 {strides = array<i32>} : memref<64x128xf32, #tpu.memory_space<vmem>>, vector<8x128xf32>,
    %c16 = arith.constant 16 : index
    %c0_26 = arith.constant 0 : index
    %61 = vector.load %arg11[%c16, %c0_26] : memref<64x512xf32, #tpu.memory_space<vmem>>, vector<8x512xf32>
    %62 = vector.extract_strided_slice %59 {offsets = [0, 0], sizes = [8, 32], strides = [1, 1]} : vector<8x128xf32> to vector<8x32xf32>
    %63 = arith.truncf %62 : vector<8x32xf32> to vector<8x32xbf16>
    %cst_27 = arith.constant dense<0.000000e+00> : vector<8x512xf32>
    %64 = tpu.matmul %63, %14, %cst_27 {dimension_numbers = #tpu.dot_dimension_numbers<[1], [0], [0], [1], [0, 0, 1, 1], [], []>} : vector<8x32xbf16>, vector<32x512xbf16>, vector<8x512xf32> -> vector<8x512xf32>
    %65 = arith.addf %61, %64 : vector<8x512xf32>
    %66 = vector.extract_strided_slice %65 {offsets = [0, 0], sizes = [8, 384], strides = [1, 1]} : vector<8x512xf32> to vector<8x384xf32>
    %67 = arith.negf %66 : vector<8x384xf32>
    %68 = math.exp %67 : vector<8x384xf32>
    %cst_28 = arith.constant 1.000000e+00 : f32
    %69 = vector.broadcast %cst_28 : f32 to vector<8x384xf32>
    %70 = arith.addf %69, %68 : vector<8x384xf32>
    %71 = arith.divf %69, %70 : vector<8x384xf32>
    %72 = vector.extract_strided_slice %71 {offsets = [0, 0], sizes = [8, 128], strides = [1, 1]} : vector<8x384xf32> to vector<8x128xf32>
    %73 = vector.extract_strided_slice %71 {offsets = [0, 128], sizes = [8, 128], strides = [1, 1]} : vector<8x384xf32> to vector<8x128xf32>
    %74 = vector.extract_strided_slice %71 {offsets = [0, 256], sizes = [8, 128], strides = [1, 1]} : vector<8x384xf32> to vector<8x128xf32>
    %75 = vector.extract_strided_slice %65 {offsets = [0, 384], sizes = [8, 128], strides = [1, 1]} : vector<8x512xf32> to vector<8x128xf32>
    %76 = math.tanh %75 : vector<8x128xf32>
    %77 = arith.mulf %73, %57 : vector<8x128xf32>
    %78 = arith.mulf %72, %76 : vector<8x128xf32>
    %79 = arith.addf %77, %78 : vector<8x128xf32>
    %80 = math.tanh %79 : vector<8x128xf32>
    %81 = arith.mulf %74, %80 : vector<8x128xf32>
    %c16_29 = arith.constant 16 : index
    %c0_30 = arith.constant 0 : index
    %82 = vector.load %arg10[%c16_29, %c0_30] : memref<64x128xf32, #tpu.memory_space<vmem>>, vector<8x128xf32>
    tpu.vector_store %arg10[%c16_29, %c0_30], %81 {strides = array<i32>} : memref<64x128xf32, #tpu.memory_space<vmem>>, vector<8x128xf32>,
    %c24 = arith.constant 24 : index
    %c0_31 = arith.constant 0 : index
    %83 = vector.load %arg11[%c24, %c0_31] : memref<64x512xf32, #tpu.memory_space<vmem>>, vector<8x512xf32>
    %84 = vector.extract_strided_slice %81 {offsets = [0, 0], sizes = [8, 32], strides = [1, 1]} : vector<8x128xf32> to vector<8x32xf32>
    %85 = arith.truncf %84 : vector<8x32xf32> to vector<8x32xbf16>
    %cst_32 = arith.constant dense<0.000000e+00> : vector<8x512xf32>
    %86 = tpu.matmul %85, %14, %cst_32 {dimension_numbers = #tpu.dot_dimension_numbers<[1], [0], [0], [1], [0, 0, 1, 1], [], []>} : vector<8x32xbf16>, vector<32x512xbf16>, vector<8x512xf32> -> vector<8x512xf32>
    %87 = arith.addf %83, %86 : vector<8x512xf32>
    %88 = vector.extract_strided_slice %87 {offsets = [0, 0], sizes = [8, 384], strides = [1, 1]} : vector<8x512xf32> to vector<8x384xf32>
    %89 = arith.negf %88 : vector<8x384xf32>
    %90 = math.exp %89 : vector<8x384xf32>
    %cst_33 = arith.constant 1.000000e+00 : f32
    %91 = vector.broadcast %cst_33 : f32 to vector<8x384xf32>
    %92 = arith.addf %91, %90 : vector<8x384xf32>
    %93 = arith.divf %91, %92 : vector<8x384xf32>
    %94 = vector.extract_strided_slice %93 {offsets = [0, 0], sizes = [8, 128], strides = [1, 1]} : vector<8x384xf32> to vector<8x128xf32>
    %95 = vector.extract_strided_slice %93 {offsets = [0, 128], sizes = [8, 128], strides = [1, 1]} : vector<8x384xf32> to vector<8x128xf32>
    %96 = vector.extract_strided_slice %93 {offsets = [0, 256], sizes = [8, 128], strides = [1, 1]} : vector<8x384xf32> to vector<8x128xf32>
    %97 = vector.extract_strided_slice %87 {offsets = [0, 384], sizes = [8, 128], strides = [1, 1]} : vector<8x512xf32> to vector<8x128xf32>
    %98 = math.tanh %97 : vector<8x128xf32>
    %99 = arith.mulf %95, %79 : vector<8x128xf32>
    %100 = arith.mulf %94, %98 : vector<8x128xf32>
    %101 = arith.addf %99, %100 : vector<8x128xf32>
    %102 = math.tanh %101 : vector<8x128xf32>
    %103 = arith.mulf %96, %102 : vector<8x128xf32>
    %c24_34 = arith.constant 24 : index
    %c0_35 = arith.constant 0 : index
    %104 = vector.load %arg10[%c24_34, %c0_35] : memref<64x128xf32, #tpu.memory_space<vmem>>, vector<8x128xf32>
    tpu.vector_store %arg10[%c24_34, %c0_35], %103 {strides = array<i32>} : memref<64x128xf32, #tpu.memory_space<vmem>>, vector<8x128xf32>,
    %c32 = arith.constant 32 : index
    %c0_36 = arith.constant 0 : index
    %105 = vector.load %arg11[%c32, %c0_36] : memref<64x512xf32, #tpu.memory_space<vmem>>, vector<8x512xf32>
    %106 = vector.extract_strided_slice %103 {offsets = [0, 0], sizes = [8, 32], strides = [1, 1]} : vector<8x128xf32> to vector<8x32xf32>
    %107 = arith.truncf %106 : vector<8x32xf32> to vector<8x32xbf16>
    %cst_37 = arith.constant dense<0.000000e+00> : vector<8x512xf32>
    %108 = tpu.matmul %107, %14, %cst_37 {dimension_numbers = #tpu.dot_dimension_numbers<[1], [0], [0], [1], [0, 0, 1, 1], [], []>} : vector<8x32xbf16>, vector<32x512xbf16>, vector<8x512xf32> -> vector<8x512xf32>
    %109 = arith.addf %105, %108 : vector<8x512xf32>
    %110 = vector.extract_strided_slice %109 {offsets = [0, 0], sizes = [8, 384], strides = [1, 1]} : vector<8x512xf32> to vector<8x384xf32>
    %111 = arith.negf %110 : vector<8x384xf32>
    %112 = math.exp %111 : vector<8x384xf32>
    %cst_38 = arith.constant 1.000000e+00 : f32
    %113 = vector.broadcast %cst_38 : f32 to vector<8x384xf32>
    %114 = arith.addf %113, %112 : vector<8x384xf32>
    %115 = arith.divf %113, %114 : vector<8x384xf32>
    %116 = vector.extract_strided_slice %115 {offsets = [0, 0], sizes = [8, 128], strides = [1, 1]} : vector<8x384xf32> to vector<8x128xf32>
    %117 = vector.extract_strided_slice %115 {offsets = [0, 128], sizes = [8, 128], strides = [1, 1]} : vector<8x384xf32> to vector<8x128xf32>
    %118 = vector.extract_strided_slice %115 {offsets = [0, 256], sizes = [8, 128], strides = [1, 1]} : vector<8x384xf32> to vector<8x128xf32>
    %119 = vector.extract_strided_slice %109 {offsets = [0, 384], sizes = [8, 128], strides = [1, 1]} : vector<8x512xf32> to vector<8x128xf32>
    %120 = math.tanh %119 : vector<8x128xf32>
    %121 = arith.mulf %117, %101 : vector<8x128xf32>
    %122 = arith.mulf %116, %120 : vector<8x128xf32>
    %123 = arith.addf %121, %122 : vector<8x128xf32>
    %124 = math.tanh %123 : vector<8x128xf32>
    %125 = arith.mulf %118, %124 : vector<8x128xf32>
    %c32_39 = arith.constant 32 : index
    %c0_40 = arith.constant 0 : index
    %126 = vector.load %arg10[%c32_39, %c0_40] : memref<64x128xf32, #tpu.memory_space<vmem>>, vector<8x128xf32>
    tpu.vector_store %arg10[%c32_39, %c0_40], %125 {strides = array<i32>} : memref<64x128xf32, #tpu.memory_space<vmem>>, vector<8x128xf32>,
    %c40 = arith.constant 40 : index
    %c0_41 = arith.constant 0 : index
    %127 = vector.load %arg11[%c40, %c0_41] : memref<64x512xf32, #tpu.memory_space<vmem>>, vector<8x512xf32>
    %128 = vector.extract_strided_slice %125 {offsets = [0, 0], sizes = [8, 32], strides = [1, 1]} : vector<8x128xf32> to vector<8x32xf32>
    %129 = arith.truncf %128 : vector<8x32xf32> to vector<8x32xbf16>
    %cst_42 = arith.constant dense<0.000000e+00> : vector<8x512xf32>
    %130 = tpu.matmul %129, %14, %cst_42 {dimension_numbers = #tpu.dot_dimension_numbers<[1], [0], [0], [1], [0, 0, 1, 1], [], []>} : vector<8x32xbf16>, vector<32x512xbf16>, vector<8x512xf32> -> vector<8x512xf32>
    %131 = arith.addf %127, %130 : vector<8x512xf32>
    %132 = vector.extract_strided_slice %131 {offsets = [0, 0], sizes = [8, 384], strides = [1, 1]} : vector<8x512xf32> to vector<8x384xf32>
    %133 = arith.negf %132 : vector<8x384xf32>
    %134 = math.exp %133 : vector<8x384xf32>
    %cst_43 = arith.constant 1.000000e+00 : f32
    %135 = vector.broadcast %cst_43 : f32 to vector<8x384xf32>
    %136 = arith.addf %135, %134 : vector<8x384xf32>
    %137 = arith.divf %135, %136 : vector<8x384xf32>
    %138 = vector.extract_strided_slice %137 {offsets = [0, 0], sizes = [8, 128], strides = [1, 1]} : vector<8x384xf32> to vector<8x128xf32>
    %139 = vector.extract_strided_slice %137 {offsets = [0, 128], sizes = [8, 128], strides = [1, 1]} : vector<8x384xf32> to vector<8x128xf32>
    %140 = vector.extract_strided_slice %137 {offsets = [0, 256], sizes = [8, 128], strides = [1, 1]} : vector<8x384xf32> to vector<8x128xf32>
    %141 = vector.extract_strided_slice %131 {offsets = [0, 384], sizes = [8, 128], strides = [1, 1]} : vector<8x512xf32> to vector<8x128xf32>
    %142 = math.tanh %141 : vector<8x128xf32>
    %143 = arith.mulf %139, %123 : vector<8x128xf32>
    %144 = arith.mulf %138, %142 : vector<8x128xf32>
    %145 = arith.addf %143, %144 : vector<8x128xf32>
    %146 = math.tanh %145 : vector<8x128xf32>
    %147 = arith.mulf %140, %146 : vector<8x128xf32>
    %c40_44 = arith.constant 40 : index
    %c0_45 = arith.constant 0 : index
    %148 = vector.load %arg10[%c40_44, %c0_45] : memref<64x128xf32, #tpu.memory_space<vmem>>, vector<8x128xf32>
    tpu.vector_store %arg10[%c40_44, %c0_45], %147 {strides = array<i32>} : memref<64x128xf32, #tpu.memory_space<vmem>>, vector<8x128xf32>,
    %c48 = arith.constant 48 : index
    %c0_46 = arith.constant 0 : index
    %149 = vector.load %arg11[%c48, %c0_46] : memref<64x512xf32, #tpu.memory_space<vmem>>, vector<8x512xf32>
    %150 = vector.extract_strided_slice %147 {offsets = [0, 0], sizes = [8, 32], strides = [1, 1]} : vector<8x128xf32> to vector<8x32xf32>
    %151 = arith.truncf %150 : vector<8x32xf32> to vector<8x32xbf16>
    %cst_47 = arith.constant dense<0.000000e+00> : vector<8x512xf32>
    %152 = tpu.matmul %151, %14, %cst_47 {dimension_numbers = #tpu.dot_dimension_numbers<[1], [0], [0], [1], [0, 0, 1, 1], [], []>} : vector<8x32xbf16>, vector<32x512xbf16>, vector<8x512xf32> -> vector<8x512xf32>
    %153 = arith.addf %149, %152 : vector<8x512xf32>
    %154 = vector.extract_strided_slice %153 {offsets = [0, 0], sizes = [8, 384], strides = [1, 1]} : vector<8x512xf32> to vector<8x384xf32>
    %155 = arith.negf %154 : vector<8x384xf32>
    %156 = math.exp %155 : vector<8x384xf32>
    %cst_48 = arith.constant 1.000000e+00 : f32
    %157 = vector.broadcast %cst_48 : f32 to vector<8x384xf32>
    %158 = arith.addf %157, %156 : vector<8x384xf32>
    %159 = arith.divf %157, %158 : vector<8x384xf32>
    %160 = vector.extract_strided_slice %159 {offsets = [0, 0], sizes = [8, 128], strides = [1, 1]} : vector<8x384xf32> to vector<8x128xf32>
    %161 = vector.extract_strided_slice %159 {offsets = [0, 128], sizes = [8, 128], strides = [1, 1]} : vector<8x384xf32> to vector<8x128xf32>
    %162 = vector.extract_strided_slice %159 {offsets = [0, 256], sizes = [8, 128], strides = [1, 1]} : vector<8x384xf32> to vector<8x128xf32>
    %163 = vector.extract_strided_slice %153 {offsets = [0, 384], sizes = [8, 128], strides = [1, 1]} : vector<8x512xf32> to vector<8x128xf32>
    %164 = math.tanh %163 : vector<8x128xf32>
    %165 = arith.mulf %161, %145 : vector<8x128xf32>
    %166 = arith.mulf %160, %164 : vector<8x128xf32>
    %167 = arith.addf %165, %166 : vector<8x128xf32>
    %168 = math.tanh %167 : vector<8x128xf32>
    %169 = arith.mulf %162, %168 : vector<8x128xf32>
    %c48_49 = arith.constant 48 : index
    %c0_50 = arith.constant 0 : index
    %170 = vector.load %arg10[%c48_49, %c0_50] : memref<64x128xf32, #tpu.memory_space<vmem>>, vector<8x128xf32>
    tpu.vector_store %arg10[%c48_49, %c0_50], %169 {strides = array<i32>} : memref<64x128xf32, #tpu.memory_space<vmem>>, vector<8x128xf32>,
    %c56 = arith.constant 56 : index
    %c0_51 = arith.constant 0 : index
    %171 = vector.load %arg11[%c56, %c0_51] : memref<64x512xf32, #tpu.memory_space<vmem>>, vector<8x512xf32>
    %172 = vector.extract_strided_slice %169 {offsets = [0, 0], sizes = [8, 32], strides = [1, 1]} : vector<8x128xf32> to vector<8x32xf32>
    %173 = arith.truncf %172 : vector<8x32xf32> to vector<8x32xbf16>
    %cst_52 = arith.constant dense<0.000000e+00> : vector<8x512xf32>
    %174 = tpu.matmul %173, %14, %cst_52 {dimension_numbers = #tpu.dot_dimension_numbers<[1], [0], [0], [1], [0, 0, 1, 1], [], []>} : vector<8x32xbf16>, vector<32x512xbf16>, vector<8x512xf32> -> vector<8x512xf32>
    %175 = arith.addf %171, %174 : vector<8x512xf32>
    %176 = vector.extract_strided_slice %175 {offsets = [0, 0], sizes = [8, 384], strides = [1, 1]} : vector<8x512xf32> to vector<8x384xf32>
    %177 = arith.negf %176 : vector<8x384xf32>
    %178 = math.exp %177 : vector<8x384xf32>
    %cst_53 = arith.constant 1.000000e+00 : f32
    %179 = vector.broadcast %cst_53 : f32 to vector<8x384xf32>
    %180 = arith.addf %179, %178 : vector<8x384xf32>
    %181 = arith.divf %179, %180 : vector<8x384xf32>
    %182 = vector.extract_strided_slice %181 {offsets = [0, 0], sizes = [8, 128], strides = [1, 1]} : vector<8x384xf32> to vector<8x128xf32>
    %183 = vector.extract_strided_slice %181 {offsets = [0, 128], sizes = [8, 128], strides = [1, 1]} : vector<8x384xf32> to vector<8x128xf32>
    %184 = vector.extract_strided_slice %181 {offsets = [0, 256], sizes = [8, 128], strides = [1, 1]} : vector<8x384xf32> to vector<8x128xf32>
    %185 = vector.extract_strided_slice %175 {offsets = [0, 384], sizes = [8, 128], strides = [1, 1]} : vector<8x512xf32> to vector<8x128xf32>
    %186 = math.tanh %185 : vector<8x128xf32>
    %187 = arith.mulf %183, %167 : vector<8x128xf32>
    %188 = arith.mulf %182, %186 : vector<8x128xf32>
    %189 = arith.addf %187, %188 : vector<8x128xf32>
    %190 = math.tanh %189 : vector<8x128xf32>
    %191 = arith.mulf %184, %190 : vector<8x128xf32>
    %c56_54 = arith.constant 56 : index
    %c0_55 = arith.constant 0 : index
    %192 = vector.load %arg10[%c56_54, %c0_55] : memref<64x128xf32, #tpu.memory_space<vmem>>, vector<8x128xf32>
    tpu.vector_store %arg10[%c56_54, %c0_55], %191 {strides = array<i32>} : memref<64x128xf32, #tpu.memory_space<vmem>>, vector<8x128xf32>,
    %193 = arith.index_cast %arg0 : i32 to index
    %c0_56 = arith.constant 0 : index
    %c0_57 = arith.constant 0 : index
    %194 = vector.load %arg12[%193, %c0_56, %c0_57] : memref<2x8x128xf32, #tpu.memory_space<vmem>>, vector<1x8x128xf32>
    %195 = vector.shape_cast %194 : vector<1x8x128xf32> to vector<8x128xf32>
    %196 = vector.shape_cast %191 : vector<8x128xf32> to vector<1x8x128xf32>
    tpu.vector_store %arg12[%193, %c0_56, %c0_57], %196 {strides = array<i32>} : memref<2x8x128xf32, #tpu.memory_space<vmem>>, vector<1x8x128xf32>,
    %c1_i32 = arith.constant 1 : i32
    %197 = arith.cmpi eq, %arg0, %c1_i32 : i32
    %198 = arith.extui %197 : i1 to i32
    %c0_i32_58 = arith.constant 0 : i32
    %199 = arith.cmpi ne, %198, %c0_i32_58 : i32
    scf.if %199 {
      %c0_59 = arith.constant 0 : index
      %c0_60 = arith.constant 0 : index
      %c0_61 = arith.constant 0 : index
      %200 = vector.load %arg12[%c0_59, %c0_60, %c0_61] : memref<2x8x128xf32, #tpu.memory_space<vmem>>, vector<2x8x128xf32>
      %201 = vector.shape_cast %200 : vector<2x8x128xf32> to vector<16x128xf32>
      %cst_62 = arith.constant 0.000000e+00 : f32
      %202 = vector.broadcast %cst_62 : f32 to vector<16x128xf32>
      %203 = arith.maximumf %201, %202 : vector<16x128xf32>
      %c0_63 = arith.constant 0 : index
      %c0_64 = arith.constant 0 : index
      %204 = vector.load %arg5[%c0_63, %c0_64] : memref<128x128xf32, #tpu.memory_space<vmem>>, vector<128x128xf32>
      %cst_65 = arith.constant dense<0.000000e+00> : vector<16x128xf32>
      %205 = tpu.matmul %203, %204, %cst_65 {dimension_numbers = #tpu.dot_dimension_numbers<[1], [0], [0], [1], [0, 0, 1, 1], [], []>} : vector<16x128xf32>, vector<128x128xf32>, vector<16x128xf32> -> vector<16x128xf32>
      %c0_66 = arith.constant 0 : index
      %c0_67 = arith.constant 0 : index
      %206 = vector.load %arg6[%c0_66, %c0_67] : memref<1x128xf32, #tpu.memory_space<vmem>>, vector<1x128xf32>
      %207 = vector.broadcast %206 : vector<1x128xf32> to vector<16x128xf32>
      %208 = arith.addf %205, %207 : vector<16x128xf32>
      %cst_68 = arith.constant 0.000000e+00 : f32
      %209 = vector.broadcast %cst_68 : f32 to vector<16x128xf32>
      %210 = arith.maximumf %208, %209 : vector<16x128xf32>
      %c0_69 = arith.constant 0 : index
      %c0_70 = arith.constant 0 : index
      %211 = vector.load %arg7[%c0_69, %c0_70] : memref<128x128xf32, #tpu.memory_space<vmem>>, vector<128x128xf32>
      %cst_71 = arith.constant dense<0.000000e+00> : vector<16x128xf32>
      %212 = tpu.matmul %210, %211, %cst_71 {dimension_numbers = #tpu.dot_dimension_numbers<[1], [0], [0], [1], [0, 0, 1, 1], [], []>} : vector<16x128xf32>, vector<128x128xf32>, vector<16x128xf32> -> vector<16x128xf32>
      %c0_72 = arith.constant 0 : index
      %c0_73 = arith.constant 0 : index
      %213 = vector.load %arg8[%c0_72, %c0_73] : memref<1x128xf32, #tpu.memory_space<vmem>>, vector<1x128xf32>
      %214 = vector.broadcast %213 : vector<1x128xf32> to vector<16x128xf32>
      %215 = arith.addf %212, %214 : vector<16x128xf32>
      %c0_74 = arith.constant 0 : index
      %c0_75 = arith.constant 0 : index
      %216 = vector.load %arg9[%c0_74, %c0_75] : memref<16x128xf32, #tpu.memory_space<vmem>>, vector<16x128xf32>
      tpu.vector_store %arg9[%c0_74, %c0_75], %215 {strides = array<i32>} : memref<16x128xf32, #tpu.memory_space<vmem>>, vector<16x128xf32>,
    } else {
    }
    return
  }
  func.func @transform_0(%arg0: i32) -> (i32, i32) {
    %c0_i32 = arith.constant 0 : i32
    %c0_i32_0 = arith.constant 0 : i32
    %c0_i32_1 = arith.constant 0 : i32
    return %c0_i32, %c0_i32_0 : i32, i32
  }
  func.func @transform_1(%arg0: i32) -> (i32, i32, i32) {
    %c0_i32 = arith.constant 0 : i32
    %c0_i32_0 = arith.constant 0 : i32
    %c0_i32_1 = arith.constant 0 : i32
    return %arg0, %c0_i32, %c0_i32_0 : i32, i32, i32
  }
  func.func @transform_2(%arg0: i32) -> (i32, i32, i32) {
    %c0_i32 = arith.constant 0 : i32
    %c0_i32_0 = arith.constant 0 : i32
    %c0_i32_1 = arith.constant 0 : i32
    return %arg0, %c0_i32, %c0_i32_0 : i32, i32, i32
  }
  func.func @transform_3(%arg0: i32) -> (i32, i32, i32) {
    %c0_i32 = arith.constant 0 : i32
    %c0_i32_0 = arith.constant 0 : i32
    %c0_i32_1 = arith.constant 0 : i32
    return %arg0, %c0_i32, %c0_i32_0 : i32, i32, i32
  }
  func.func @transform_4(%arg0: i32) -> (i32, i32) {
    %c0_i32 = arith.constant 0 : i32
    %c0_i32_0 = arith.constant 0 : i32
    %c0_i32_1 = arith.constant 0 : i32
    return %c0_i32, %c0_i32_0 : i32, i32
  }
  func.func @transform_5(%arg0: i32) -> (i32, i32) {
    %c0_i32 = arith.constant 0 : i32
    %c0_i32_0 = arith.constant 0 : i32
    %c0_i32_1 = arith.constant 0 : i32
    return %c0_i32, %c0_i32_0 : i32, i32
  }
  func.func @transform_6(%arg0: i32) -> (i32, i32) {
    %c0_i32 = arith.constant 0 : i32
    %c0_i32_0 = arith.constant 0 : i32
    %c0_i32_1 = arith.constant 0 : i32
    return %c0_i32, %c0_i32_0 : i32, i32
  }
  func.func @transform_7(%arg0: i32) -> (i32, i32) {
    %c0_i32 = arith.constant 0 : i32
    %c0_i32_0 = arith.constant 0 : i32
    %c0_i32_1 = arith.constant 0 : i32
    return %c0_i32, %c0_i32_0 : i32, i32
  }
  func.func @transform_8(%arg0: i32) -> (i32, i32) {
    %c0_i32 = arith.constant 0 : i32
    %c0_i32_0 = arith.constant 0 : i32
    %c0_i32_1 = arith.constant 0 : i32
    return %c0_i32, %c0_i32_0 : i32, i32
  }
}

</mosaic_0001>

<bundles_post_ra>
// kernel: tpu_custom_call.1
= control target key start
LH: loop header
LB: loop body
LE: loop exit
PB: predicated region body
PF: predicated region fallthrough
CT: control target
= control target key end

     0   :  { %s3358_s0 = inlined_call_operand.hbm [shape: f32[64,128], index: 0, kind: input, shape index: {}]   ;;  %s3359_s1 = inlined_call_operand.hbm [shape: bf16[2,32,512], index: 1, kind: input, shape index: {}]   ;;  %s3360_s2 = inlined_call_operand.hbm [shape: bf16[2,32,512], index: 2, kind: input, shape index: {}]   ;;  %s3361_s3 = inlined_call_operand.vmem [shape: f32[2,1,512], index: 3, kind: input, shape index: {}]   ;;  %s3362_s4 = inlined_call_operand.hbm [shape: f32[128,128], index: 4, kind: input, shape index: {}]   ;;  %s3363_s5 = inlined_call_operand.vmem [shape: f32[1,128], index: 5, kind: input, shape index: {}]   ;;  %s3364_s6 = inlined_call_operand.hbm [shape: f32[128,128], index: 6, kind: input, shape index: {}]   ;;  %s3365_s7 = inlined_call_operand.vmem [shape: f32[1,128], index: 7, kind: input, shape index: {}]   ;;  %s3366_s8 = inlined_call_operand.hbm [shape: f32[16,128], index: 8, kind: output, shape index: {}]  }
   0x1   :  { %3383 = sst [smem:[#allocation22_spill]] %s3359_s1 }
   0x2   :  { %3384 = sst [smem:[#allocation23_spill]] %s3362_s4 }
   0x3   :  { %3385 = sst [smem:[#allocation24_spill]] %s3363_s5 }
   0x4   :  { %3386 = sst [smem:[#allocation25_spill]] %s3365_s7 }
   0x5   :  { %3387 = sst [smem:[#allocation26_spill]] %s3366_s8 }
   0x6   :  { %13 = vsyncpa [#allocation6], 0 }
   0x7   :  { %14 = vsyncpa [#allocation9], 0 }
   0x8   :  { %16 = vsyncpa [#allocation9 + $0x1], 0 }
   0x9   :  { %17 = vsyncpa [#allocation12], 0 }
   0xa   :  { %18 = vsyncpa [#allocation7], 0  ;;  %s2817_s27 = smov 0   ;;  %s2819_s28 = smov 0  }
   0xb   :  { %s2821_s29 = smov 0   ;;  %s2823_s30 = smov 0  }
   0xc LB: > { %3388 = sst [smem:[#allocation19_spill]] %s2753_s29  ;;  %s2836_s9 = sadd.s32 4294967295, %s2757_s30   ;;  %s2757_s30 = sphi %s2823_s30, %s3414_s30   ;;  %s2753_s29 = sphi %s2821_s29, %s3416_s29   ;;  %s2749_s28 = sphi %s2819_s28, %s3418_s28   ;;  %s2745_s27 = sphi %s2817_s27, %s3417_s27  }
   0xd   : > { %p65_p0 = scmp.ne.s32.totalorder %s2749_s28, %s2745_s27  ;;  %p3367_p1 = scmp.eq.s32.totalorder %s2836_s9, 0 }
   0xe   : > { %p2039_p2 = scmp.ge.s32.totalorder %s2757_s30, 1  ;;  %p233_p3 = scmp.lt.s32.totalorder %s2757_s30, 3 }
   0xf   : > { %p2845_p5 = por %p3367_p1, %p65_p0  ;;  %s2759_s12 = smov [#allocation11]  }
  0x10   : > { %p2849_p6 = pnand %p2039_p2, %p233_p3  ;;  %s258_s13 = sshll.u32 %s2759_s12, 4  ;;  %s259_s13 = int_to_ptr.vmem [resolvable:$true] %s258_s13 }
  0x11   : > { %s3389_s10 = scalar_select %p2845_p5, 1, 0 }
  0x12   : > { %s3390_s11 = scalar_select %p2849_p6, 1, 0 }
  0x13   : > { %p2320_p7 = pneg %p2849_p6  ;;  %s2862_s15 = sadd.s32 1, %s2757_s30  }
  0x14   : > { %3392 = sst [smem:[#allocation20_spill]] %s2862_s15  ;;  %s52_s16 = sadd.s32 1, %s2753_s29 }
  0x15   : > { %p2857_p8 = pnand %p2320_p7, %p3367_p1  ;;  %s49_s17 = ssub.s32 %s2757_s30, %s2862_s15 }
  0x16   : > { %s3393_s4 = sld [smem:[#allocation23_spill]] }
  0x17   : > { %s3391_s14 = scalar_select %p2857_p8, 1, 0 }
  0x18   : > { %p2875_p10 = pneg %p2857_p8 }
  0x1c   : > { %s2541_s20 = scalar_lea.hbm %s3393_s4, 2048 }
  0x1d   : > { %p2542_p9 = scmp.ne.s32.totalorder %s3393_s4, %s2541_s20  ;;  %p2548_p13 = scmp.lt.u32.totalorder %s2541_s20, %s3393_s4 }
  0x1f   : > { %p2544_p11 = pnand %p2875_p10, %p2542_p9 }
  0x21   : > { %p2545_p12 = pneg %p2544_p11 }
  0x23   : > { %p2550_p0 = pnand %p2548_p13, %p2545_p12 }
  0x25   : > { %2553 = shalt.err (!%p2550_p0)
}
  0x26   : > { %s2554_s26 = scalar_lea.vmem %s259_s13, 2048  ;;  %p2562_p4 = scmp.lt.s32.totalorder %s259_s13, %s259_s13 }
  0x27   : > { %p2555_p2 = scmp.ne.s32.totalorder %s259_s13, %s2554_s26  ;;  %p2563_p1 = scmp.lt.s32.totalorder %s2554_s26, %s2554_s26 }
  0x29   : > { %p2557_p3 = pnand %p2555_p2, %p2875_p10  ;;  %p2564_p5 = por %p2563_p1, %p2562_p4 }
  0x2b   : > { %p2558_p7 = pneg %p2557_p3 }
  0x2d   : > { %p2565_p6 = pnand %p2564_p5, %p2558_p7 }
  0x2f   : > { %2568 = shalt.err (!%p2565_p6)
}
  0x30   : > { %s3373_s27 = smov 128   ;;  %s3377_s12 = smov 8  }
  0x31   : > { %2326 = dma.hbm_to_vmem [thread:$0]  (!%p2857_p8), %s3393_s4, 2048, %s259_s13, [#allocation12], %s3373_s27, %s3373_s27, %s3377_s12  }
  0x32   : > { %p50_p1 = scmp.eq.s32.totalorder %s49_s17, 0  ;;  %p59_p4 = scmp.ne.s32.totalorder %s2753_s29, %s2749_s28 }
  0x33   : > { %p60_p5 = scmp.eq.s32.totalorder %s2757_s30, 0  ;;  %p2340_p6 = scmp.lt.s32.totalorder %s2757_s30, 2 }
  0x34   : > { %s2899_s20 = scalar_select %p50_p1, %s2753_s29, %s52_s16  }
  0x35   : > { %p61_p9 = por %p60_p5, %p59_p4  ;;  %s291_s21 = sand.u32 1, %s2757_s30  }
  0x36   : > { %3395 = sst [smem:[#allocation21_spill]] %s2899_s20  ;;  %s293_s22 = sand.u32 1, %s2753_s29  }
  0x37   : > { %s2903_s24 = sshll.u32 %s293_s22, 6  ;;  %s2128_s25 = sshll.u32 %s2757_s30, 10 }
  0x38   : > { %s3396_s1 = sld [smem:[#allocation22_spill]]  ;;  %s295_s13 = scalar_lea.vmem [#allocation8], %s2903_s24 }
  0x39   : > { %s302_s16 = sshll.u32 %s295_s13, 4  ;;  %p2914_p11 = pnand %p2340_p6, %p61_p9  ;;  %s2918_s16 = int_to_ptr.vmem [resolvable:$true] %s302_s16 }
  0x3a   : > { %s2920_s18 = scalar_lea.sflag [#allocation9], %s291_s21 }
  0x3b   : > { %s3397_s17 = scalar_select %p2914_p11, 1, 0 }
  0x3c   : > { %p3380_p13 = pneg %p2914_p11 }
  0x3e   : > { %s2911_s8 = scalar_lea.hbm %s3396_s1, %s2128_s25  ;;  %s2574_s26 = scalar_lea.hbm %s3396_s1, 2048 }
  0x3f   : > { %s2569_s19 = scalar_lea.hbm %s2911_s8, 1024  ;;  %p2575_p3 = scmp.lt.u32.totalorder %s2911_s8, %s3396_s1 }
  0x40   : > { %p2570_p12 = scmp.ne.s32.totalorder %s2911_s8, %s2569_s19  ;;  %p2576_p7 = scmp.lt.u32.totalorder %s2574_s26, %s2569_s19 }
  0x41   : > { %p2578_p4 = scmp.lt.u32.totalorder %s2569_s19, %s2911_s8 }
  0x42   : > { %p2572_p0 = pnand %p3380_p13, %p2570_p12  ;;  %p2577_p1 = por %p2576_p7, %p2575_p3 }
  0x44   : > { %p2573_p2 = pneg %p2572_p0  ;;  %p2579_p5 = por %p2578_p4, %p2577_p1 }
  0x46   : > { %p2580_p6 = pnand %p2579_p5, %p2573_p2 }
  0x48   : > { %2583 = shalt.err (!%p2580_p6)
}
  0x49   : > { %s2584_s21 = scalar_lea.vmem %s2918_s16, 1024  ;;  %s2762_s15 = smov [#allocation8]  }
  0x4a   : > { %p2585_p9 = scmp.ne.s32.totalorder %s2918_s16, %s2584_s21  ;;  %s2589_s22 = sshll.u32 %s2762_s15, 4  ;;  %s2590_s22 = int_to_ptr.vmem [resolvable:$false] %s2589_s22 }
  0x4b   : > { %s2591_s27 = scalar_lea.vmem %s2590_s22, 2048  ;;  %p2592_p8 = scmp.lt.s32.totalorder %s2918_s16, %s2590_s22 }
  0x4c   : > { %p2587_p12 = pnand %p2585_p9, %p3380_p13  ;;  %p2593_p3 = scmp.lt.s32.totalorder %s2591_s27, %s2584_s21 }
  0x4e   : > { %p2588_p0 = pneg %p2587_p12  ;;  %p2594_p7 = por %p2593_p3, %p2592_p8 }
  0x50   : > { %p2595_p1 = pnand %p2594_p7, %p2588_p0 }
  0x52   : > { %2598 = shalt.err (!%p2595_p1)
}
  0x53   : > { %s2763_s19 = smov 256   ;;  %s2764_s26 = smov 16  }
  0x54   : > { %2333 = dma.hbm_to_vmem [thread:$0]  (!%p2914_p11), %s2911_s8, 1024, %s2918_s16, %s2920_s18, %s2763_s19, %s2763_s19, %s2764_s26  }
  0x55   : > { %s2956_s15 = scalar_lea.hbm %s3360_s2, %s2128_s25  ;;  %s316_s22 = scalar_lea.vmem [#allocation10], %s2903_s24 }
  0x56   : > { %s323_s27 = sshll.u32 %s316_s22, 4  ;;  %s2765_s12 = smov [#allocation5]   ;;  %s2980_s27 = int_to_ptr.vmem [resolvable:$true] %s323_s27 }
  0x57   : > { %s245_s1 = sshll.u32 %s2765_s12, 4  ;;  %s2599_s29 = scalar_lea.hbm %s3358_s0, 1024  ;;  %s246_s1 = int_to_ptr.vmem [resolvable:$true] %s245_s1 }
  0x58   : > { %p2600_p8 = scmp.ne.s32.totalorder %s3358_s0, %s2599_s29  ;;  %p2606_p5 = scmp.lt.u32.totalorder %s2599_s29, %s3358_s0 }
  0x5a   : > { %p2602_p2 = pnand %p2600_p8, %p2875_p10 }
  0x5c   : > { %p2603_p4 = pneg %p2602_p2 }
  0x5e   : > { %p2608_p6 = pnand %p2606_p5, %p2603_p4 }
  0x60   : > { %2611 = shalt.err (!%p2608_p6)
}
  0x61   : > { %s2612_s24 = scalar_lea.vmem %s246_s1, 1024  ;;  %p2620_p3 = scmp.lt.s32.totalorder %s246_s1, %s246_s1 }
  0x62   : > { %p2613_p9 = scmp.ne.s32.totalorder %s246_s1, %s2612_s24  ;;  %p2621_p7 = scmp.lt.s32.totalorder %s2612_s24, %s2612_s24 }
  0x64   : > { %p2615_p12 = pnand %p2613_p9, %p2875_p10  ;;  %p2622_p1 = por %p2621_p7, %p2620_p3 }
  0x66   : > { %p2616_p0 = pneg %p2615_p12 }
  0x68   : > { %p2623_p13 = pnand %p2622_p1, %p2616_p0 }
  0x6a   : > { %2626 = shalt.err (!%p2623_p13)
}
  0x6b   : > { %p3398_p8 = scmp.ne.s32.totalorder %s3391_s14, 0  ;;  %s3399_s4 = smov 8  }
  0x6c   : > { %s3400_s5 = smov 128   ;;  %s2766_s12 = smov [#allocation13]  }
  0x6d   : > { %2323 = dma.hbm_to_vmem [thread:$0]  (!%p3398_p8), %s3358_s0, 1024, %s246_s1, [#allocation6], %s3400_s5, %s3400_s5, %s3399_s4  }
  0x6e   : > { %s274_s20 = sshll.u32 %s2766_s12, 4  ;;  %s2627_s13 = scalar_lea.hbm %s3364_s6, 2048  ;;  %s275_s20 = int_to_ptr.vmem [resolvable:$true] %s274_s20 }
  0x6f   : > { %p2628_p13 = scmp.ne.s32.totalorder %s3364_s6, %s2627_s13  ;;  %p2634_p5 = scmp.lt.u32.totalorder %s2627_s13, %s3364_s6 }
  0x71   : > { %p2630_p2 = pnand %p2628_p13, %p2875_p10 }
  0x73   : > { %p2631_p4 = pneg %p2630_p2 }
  0x75   : > { %p2636_p6 = pnand %p2634_p5, %p2631_p4 }
  0x77   : > { %2639 = shalt.err (!%p2636_p6)
}
  0x78   : > { %s2640_s1 = scalar_lea.vmem %s275_s20, 2048  ;;  %p2648_p3 = scmp.lt.s32.totalorder %s275_s20, %s275_s20 }
  0x79   : > { %p2641_p9 = scmp.ne.s32.totalorder %s275_s20, %s2640_s1  ;;  %p2649_p7 = scmp.lt.s32.totalorder %s2640_s1, %s2640_s1 }
  0x7b   : > { %p2643_p12 = pnand %p2641_p9, %p2875_p10  ;;  %p2650_p1 = por %p2649_p7, %p2648_p3 }
  0x7d   : > { %p2644_p0 = pneg %p2643_p12 }
  0x7f   : > { %p2651_p11 = pnand %p2650_p1, %p2644_p0 }
  0x81   : > { %2654 = shalt.err (!%p2651_p11)
}
  0x82   : > { %2329 = dma.hbm_to_vmem [thread:$0]  (!%p3398_p8), %s3364_s6, 2048, %s275_s20, [#allocation12], %s3400_s5, %s3400_s5, %s3399_s4  }
  0x83   : > { %s2655_s23 = scalar_lea.hbm %s2956_s15, 1024  ;;  %p3401_p13 = scmp.ne.s32.totalorder %s3397_s17, 0 }
  0x84   : > { %p2656_p10 = scmp.ne.s32.totalorder %s2956_s15, %s2655_s23  ;;  %s2660_s12 = scalar_lea.hbm %s3360_s2, 2048 }
  0x85   : > { %p3402_p2 = pneg %p3401_p13  ;;  %p2661_p5 = scmp.lt.u32.totalorder %s2956_s15, %s3360_s2 }
  0x86   : > { %p2662_p6 = scmp.lt.u32.totalorder %s2660_s12, %s2655_s23  ;;  %p2664_p12 = scmp.lt.u32.totalorder %s2655_s23, %s2956_s15 }
  0x87   : > { %p2658_p4 = pnand %p2656_p10, %p3402_p2 }
  0x88   : > { %p2663_p9 = por %p2662_p6, %p2661_p5 }
  0x89   : > { %p2659_p11 = pneg %p2658_p4 }
  0x8a   : > { %p2665_p0 = por %p2664_p12, %p2663_p9 }
  0x8c   : > { %p2666_p3 = pnand %p2665_p0, %p2659_p11 }
  0x8e   : > { %2669 = shalt.err (!%p2666_p3)
}
  0x8f   : > { %s2670_s4 = scalar_lea.vmem %s2980_s27, 1024  ;;  %p3403_p7 = pmov %p3402_p2 }
  0x90   : > { %p2671_p8 = scmp.ne.s32.totalorder %s2980_s27, %s2670_s4  ;;  %s2767_s5 = smov [#allocation10]  }
  0x91   : > { %s2675_s20 = sshll.u32 %s2767_s5, 4  ;;  %s2676_s20 = int_to_ptr.vmem [resolvable:$false] %s2675_s20 }
  0x92   : > { %p2673_p1 = pnand %p2671_p8, %p3403_p7  ;;  %s2677_s13 = scalar_lea.vmem %s2676_s20, 2048 }
  0x93   : > { %p2678_p2 = scmp.lt.s32.totalorder %s2980_s27, %s2676_s20  ;;  %p2679_p4 = scmp.lt.s32.totalorder %s2677_s13, %s2670_s4 }
  0x94   : > { %p2674_p10 = pneg %p2673_p1 }
  0x95   : > { %p2680_p5 = por %p2679_p4, %p2678_p2 }
  0x97   : > { %p2681_p6 = pnand %p2680_p5, %p2674_p10 }
  0x99   : > { %2684 = shalt.err (!%p2681_p6)
}
  0x9a   : > { %2336 = dma.hbm_to_vmem [thread:$0]  (!%p3401_p13), %s2956_s15, 1024, %s2980_s27, %s2920_s18, %s2763_s19, %s2763_s19, %s2764_s26  }
  0x9b   : > { %p3404_p11 = scmp.ne.s32.totalorder %s3390_s11, 0 }
  0x9c   : > { %p3405_p9 = scmp.eq.s32.totalorder (!%p3404_p11), %s2836_s9, 0 }
  0x9d   : > { %342 = sbr.rel (%p3404_p11) target bundleno = 2780 (0xadc), region = 52 }
  0xa4   : > { %2728 = dma.done.wait (%p3405_p9), [#allocation6], 1024   ;;  %p3406_p12 = pmov %p3405_p9 }
  0xa5   : > { %s348_s17 = sand.u32 1, %s2836_s9   ;;  %s350_s21 = sand.u32 1, %s2749_s28  }
  0xa6   : > { %2730 = vsyncadd (%p3406_p12), [#allocation6], 4294966272  ;;  %s2052_s22 = sshll.u32 %s350_s21, 6  ;;  %s349_s8 = scalar_lea.sflag [#allocation9], %s348_s17 }
  0xa7   : > { %s3038_s30 = scalar_lea.vmem [#allocation8], %s2052_s22  ;;  %p3407_p0 = scmp.ne.s32.totalorder %s3389_s10, 0 }
  0xa9   : > { %2732 = dma.done.wait (%p3407_p0), %s349_s8, 2048  }
  0xaa   : > { %2734 = vsyncadd (%p3407_p0), %s349_s8, 4294965248  ;;  %s3044_s11 = scalar_lea.vmem [#allocation10], %s2052_s22  ;;  %p3408_p13 = pmov %p3405_p9 }
  0xab   : > { %p3409_p3 = pmov %p3405_p9 }
  0xac   : > { %2736 = dma.done.wait (%p3408_p13), [#allocation12], 4096  }
  0xad   : > { %2738 = vsyncadd (%p3409_p3), [#allocation12], 4294963200  ;;  %p406_p8 = scmp.lt.s32.totalorder %s2836_s9, 1  ;;  %p3410_p7 = scmp.ne.s32.totalorder %s2836_s9, 0 }
  0xae   : > { %v415_v0 = vld [vmem:[#allocation5] sm:$0xff] (!%p3410_p7)  ;;  %v416_v1 = vld [vmem:[#allocation5 + $0x8] sm:$0xff] (!%p3410_p7)  ;;  %v417_v2 = vld [vmem:[#allocation5 + $0x10] sm:$0xff] (!%p3410_p7) }
  0xaf   : > { %s407_s18 = scalar_select %p406_p8, %s2836_s9, 1 }
  0xb0   : > { %414 = sbr.rel (%p3410_p7) target bundleno = 183 (0xb7), region = 76  ;;  %423 = vst [vmem:[#allocation2] sm:$0xff] (!%p3410_p7), %v415_v0  ;;  %424 = vst [vmem:[#allocation2 + $0x8] sm:$0xff] (!%p3410_p7), %v416_v1  ;;  %v418_v3 = vld [vmem:[#allocation5 + $0x18] sm:$0xff] (!%p3410_p7)  ;;  %v419_v4 = vld [vmem:[#allocation5 + $0x20] sm:$0xff] (!%p3410_p7) }
  0xb1   : > { %s2056_s19 = sshll.u32 %s407_s18, 2  ;;  %425 = vst [vmem:[#allocation2 + $0x10] sm:$0xff] (!%p3410_p7), %v417_v2  ;;  %v420_v5 = vld [vmem:[#allocation5 + $0x28] sm:$0xff] (!%p3410_p7)  ;;  %426 = vst [vmem:[#allocation2 + $0x18] sm:$0xff] (!%p3410_p7), %v418_v3  ;;  %v421_v6 = vld [vmem:[#allocation5 + $0x30] sm:$0xff] (!%p3410_p7) }
  0xb2   : > { %s3055_s27 = scalar_lea.vmem %s3361_s3, %s2056_s19  ;;  %427 = vst [vmem:[#allocation2 + $0x20] sm:$0xff] (!%p3410_p7), %v419_v4  ;;  %428 = vst [vmem:[#allocation2 + $0x28] sm:$0xff] (!%p3410_p7), %v420_v5  ;;  %v422_v7 = vld [vmem:[#allocation5 + $0x38] sm:$0xff] (!%p3410_p7) }
  0xb3   : > { %429 = vst [vmem:[#allocation2 + $0x30] sm:$0xff] (!%p3410_p7), %v421_v6  ;;  %430 = vst [vmem:[#allocation2 + $0x38] sm:$0xff] (!%p3410_p7), %v422_v7 }
  0xb7 PF: > { %v2389_v8 = vld [vmem:[%s3038_s30 + $0x4] ss:$16 sps:$4 sm:$0xff]   ;;  %v2391_v9 = vld [vmem:[%s3038_s30 + $0xc] ss:$16 sps:$4 sm:$0xff]   ;;  %v2768_v10 = vmov 0   ;;  %vm513_vm0 = vcmask 261120   ;;  %v453_v37 = vlaneseq }
  0xb8   : > { %558 = vmatprep.mubr.bf16.mxu0 %v2768_v10  ;;  %631 = vmatprep.mubr.bf16.mxu1 %v2768_v10  ;;  %v2393_v11 = vld [vmem:[%s3038_s30] ss:$16 sps:$4 sm:$0xff]   ;;  %v2394_v12 = vld [vmem:[%s3038_s30 + $0x8] ss:$16 sps:$4 sm:$0xff]   ;;  %v2395_v13 = vld [vmem:[%s3038_s30 + $0x24] ss:$16 sps:$4 sm:$0xff]  }
  0xb9   : > { %526 = vmatprep.subr.bf16.mxu0 %v2389_v8  ;;  %599 = vmatprep.subr.bf16.mxu1 %v2391_v9  ;;  %v2397_v14 = vld [vmem:[%s3038_s30 + $0x2c] ss:$16 sps:$4 sm:$0xff]   ;;  %v2399_v15 = vld [vmem:[%s3038_s30 + $0x20] ss:$16 sps:$4 sm:$0xff]   ;;  %v2400_v16 = vld [vmem:[%s3038_s30 + $0x28] ss:$16 sps:$4 sm:$0xff]  }
  0xba   : > { %527 = vmatpush1.bf16.msra.mxu0 %v2393_v11  ;;  %600 = vmatpush1.bf16.msra.mxu1 %v2394_v12  ;;  %v431_v17 = vld [vmem:[#allocation2] sm:$0xff]  ;;  %v432_v18 = vld [vmem:[#allocation2 + $0x8] sm:$0xff]  ;;  %v433_v25 = vld [vmem:[#allocation2 + $0x10] sm:$0xff]  ;;  %v454_v38 = vshrl.u32 %v453_v37, 7  ;;  %s2120_s10 = sshll.u32 %s2836_s9, 3  ;;  %p2121_p1 = scmp.ne.s32.totalorder %s2836_s9, 1 }
  0xbb   : > { %528 = vmatprep.subr.bf16.mxu0 %v2395_v13  ;;  %601 = vmatprep.subr.bf16.mxu1 %v2397_v14  ;;  %v3070_v19 = vld [vmem:[%s3044_s11 + $0x4] ss:$16 sps:$4 sm:$0xff]   ;;  %v439_v20 = vpack.c.bf16 %v432_v18, %v431_v17  ;;  %v3073_v21 = vld [vmem:[%s3044_s11] ss:$16 sps:$4 sm:$0xff]   ;;  %v3076_v22 = vld [vmem:[%s3044_s11 + $0xc] ss:$16 sps:$4 sm:$0xff]  }
  0xbc   : > { %v3081_v23 = vld [vmem:[%s3044_s11 + $0x24] ss:$16 sps:$4 sm:$0xff]   ;;  %v3084_v24 = vld [vmem:[%s3044_s11 + $0x8] ss:$16 sps:$4 sm:$0xff]   ;;  %v3089_v27 = vld [vmem:[%s3044_s11 + $0x20] ss:$16 sps:$4 sm:$0xff]  }
  0xbd   : > { %v434_v26 = vld [vmem:[#allocation2 + $0x18] sm:$0xff]  ;;  %v435_v31 = vld [vmem:[#allocation2 + $0x20] sm:$0xff]  ;;  %v436_v32 = vld [vmem:[#allocation2 + $0x28] sm:$0xff]  ;;  %v463_v39 = vsub.s32 2, %v454_v38  ;;  %v467_v40 = vsub.s32 3, %v454_v38  ;;  %v455_v41 = vsub.s32 0, %v454_v38 }
  0xbe   : > { %529 = vmatpush1.bf16.msra.mxu0 %v2399_v15  ;;  %602 = vmatpush1.bf16.msra.mxu1 %v2400_v16  ;;  %v3094_v28 = vld [vmem:[%s3044_s11 + $0x2c] ss:$16 sps:$4 sm:$0xff]   ;;  %v3100_v29 = vld [vmem:[%s3044_s11 + $0x28] ss:$16 sps:$4 sm:$0xff]   ;;  %v440_v30 = vpack.c.bf16 %v434_v26, %v433_v25  ;;  %v441_v33 = vpack.c.bf16 %v436_v32, %v435_v31  ;;  %v437_v34 = vld [vmem:[#allocation2 + $0x30] sm:$0xff]  ;;  %v459_v43 = vsub.s32 1, %v454_v38 }
  0xbf   : > { %759 = vmatprep.subr.bf16.mxu0 %v3070_v19  ;;  %800 = vmatprep.subr.bf16.mxu1 %v3076_v22  ;;  %v438_v35 = vld [vmem:[#allocation2 + $0x38] sm:$0xff]  ;;  %v451_v42 = vld [vmem:[%s3055_s27] sm:$0xf]  ;;  %s1704_s1 = scalar_lea.vmem [#allocation4], %s2120_s10  ;;  %s3411_s23 = sld [smem:[#allocation24_spill]] (!%p2121_p1) }
  0xc0   : > { %v442_v36 = vpack.c.bf16 %v438_v35, %v437_v34  ;;  %v3132_v44 = vrot.slane %v451_v42, %v463_v39  ;;  %v3138_v47 = vrot.slane %v451_v42, %v467_v40  ;;  %v456_v48 = vrot.slane %v451_v42, %v455_v41  ;;  %s3412_s12 = sld [smem:[#allocation25_spill]] (!%p2121_p1) }
  0xc1   : > { %2066 = vmatmul.mubr.msk.bf16.vlgmr.msra.gmra.mrb[0].mxu0 %vm513_vm0, %v439_v20  ;;  %2070 = vmatmul.mubr.msk.bf16.vlgmr.msra.gmra.mrb[0].mxu1 %vm513_vm0, %v439_v20  ;;  %v460_v51 = vrot.slane %v451_v42, %v459_v43 }
  0xc2   : > { %760 = vmatpush1.bf16.msra.mxu0 %v3073_v21  ;;  %568 = vmatprep.mubr.bf16.mxu0 %v2768_v10 }
  0xc3   : > { %641 = vmatprep.mubr.bf16.mxu1 %v2768_v10  ;;  %761 = vmatprep.subr.bf16.mxu0 %v3081_v23 }
  0xc4   : > { %801 = vmatpush1.bf16.msra.mxu1 %v3084_v24 }
  0xc5   : > { %802 = vmatprep.subr.bf16.mxu1 %v3094_v28 }
  0xc6   : > { %762 = vmatpush1.bf16.msra.mxu0 %v3089_v27 }
  0xc7   : > { %878 = vmatprep.subr.bf16.mxu0 %v3070_v19 }
  0xc8   : > { %803 = vmatpush1.bf16.msra.mxu1 %v3100_v29 }
  0xc9   : > { %2067 = vmatmul.mubr.msk.bf16.gmra.mrb[4].mxu0 %vm513_vm0, %v440_v30  ;;  %2071 = vmatmul.mubr.msk.bf16.gmra.mrb[4].mxu1 %vm513_vm0, %v440_v30 }
  0xca   : > { %578 = vmatprep.mubr.bf16.mxu0 %v2768_v10  ;;  %651 = vmatprep.mubr.bf16.mxu1 %v2768_v10 }
  0xcb   : > { %919 = vmatprep.subr.bf16.mxu1 %v3076_v22 }
  0xd1   : > { %2068 = vmatmul.mubr.msk.bf16.gmra.mrb[8].mxu0 %vm513_vm0, %v441_v33  ;;  %2072 = vmatmul.mubr.msk.bf16.gmra.mrb[8].mxu1 %vm513_vm0, %v441_v33 }
  0xd2   : > { %588 = vmatprep.mubr.bf16.mxu0 %v2768_v10  ;;  %661 = vmatprep.mubr.bf16.mxu1 %v2768_v10 }
  0xd9   : > { %2069 = vmatmul.mubr.msk.bf16.gmra.mrb[12].mxu0 %vm513_vm0, %v442_v36  ;;  %2073 = vmatmul.mubr.msk.bf16.gmra.mrb[12].mxu1 %vm513_vm0, %v442_v36 }
  0xda   : > { %791 = vmatprep.mubr.bf16.mxu0 %v2768_v10  ;;  %832 = vmatprep.mubr.bf16.mxu1 %v2768_v10 }
  0xe1   : > { %792 = vmatmul.mubr.bf16.vlgmr.msra.gmra.mrb[16].mxu0 %v2768_v10  ;;  %833 = vmatmul.mubr.bf16.vlgmr.msra.gmra.mrb[16].mxu1 %v2768_v10 }
  0xe2   : > { %879 = vmatpush1.bf16.msra.mxu0 %v3073_v21  ;;  %920 = vmatpush1.bf16.msra.mxu1 %v3084_v24 }
  0xe3   : > { %880 = vmatprep.subr.bf16.mxu0 %v3081_v23  ;;  %921 = vmatprep.subr.bf16.mxu1 %v3094_v28 }
  0xe4   : > { %910 = vmatprep.mubr.bf16.mxu0 %v2768_v10  ;;  %951 = vmatprep.mubr.bf16.mxu1 %v2768_v10 }
  0xe6   : > { %881 = vmatpush1.bf16.msra.mxu0 %v3089_v27  ;;  %922 = vmatpush1.bf16.msra.mxu1 %v3100_v29 }
  0xe7   : > { %997 = vmatprep.subr.bf16.mxu0 %v3070_v19  ;;  %1038 = vmatprep.subr.bf16.mxu1 %v3076_v22 }
 0x194   : > { %v3134_v45 = vpop.f32.mrb[0].mxu0  ;;  %v3136_v46 = vpop.f32.mrb[0].mxu1 }
 0x195   : > { %v562_v49 = vpop.f32.mrb[1].mxu0  ;;  %v635_v50 = vpop.f32.mrb[1].mxu1 }
 0x196   : > { %v564_v52 = vpop.f32.mrb[2].mxu0  ;;  %v637_v53 = vpop.f32.mrb[2].mxu1 }
 0x197   : > { %v3140_v54 = vadd.f32 %v564_v52, %v456_v48  ;;  %v566_v55 = vpop.f32.mrb[3].mxu0  ;;  %v3143_v56 = vadd.f32 %v637_v53, %v3132_v44  ;;  %v639_v57 = vpop.f32.mrb[3].mxu1 }
 0x198   : > { %v3145_v58 = vadd.f32 %v566_v55, %v460_v51  ;;  %v3148_v59 = vadd.f32 %v639_v57, %v3138_v47 }
 0x19c   : > { %v570_v60 = vpop.f32.mrb[4].mxu0  ;;  %v643_v61 = vpop.f32.mrb[4].mxu1 }
 0x19d   : > { %v3150_v62 = vadd.f32 %v570_v60, %v456_v48  ;;  %v572_v63 = vpop.f32.mrb[5].mxu0  ;;  %v3153_v0 = vadd.f32 %v643_v61, %v3132_v44  ;;  %v645_v1 = vpop.f32.mrb[5].mxu1 }
 0x19e   : > { %v3155_v2 = vadd.f32 %v572_v63, %v460_v51  ;;  %v574_v3 = vpop.f32.mrb[6].mxu0  ;;  %v3158_v4 = vadd.f32 %v645_v1, %v3138_v47  ;;  %v647_v5 = vpop.f32.mrb[6].mxu1 }
 0x19f   : > { %v3160_v6 = vadd.f32 %v574_v3, %v456_v48  ;;  %v576_v7 = vpop.f32.mrb[7].mxu0  ;;  %v3163_v8 = vadd.f32 %v647_v5, %v3132_v44  ;;  %v649_v9 = vpop.f32.mrb[7].mxu1  ;;  %v561_v5 = vadd.f32 %v3134_v45, %v456_v48 }
 0x1a0   : > { %v3165_v11 = vadd.f32 %v576_v7, %v460_v51  ;;  %v3168_v12 = vadd.f32 %v649_v9, %v3138_v47  ;;  %v634_v7 = vadd.f32 %v3136_v46, %v3132_v44  ;;  %v563_v9 = vadd.f32 %v562_v49, %v460_v51 }
 0x1a4   : > { %v580_v13 = vpop.f32.mrb[8].mxu0  ;;  %v653_v14 = vpop.f32.mrb[8].mxu1 }
 0x1a5   : > { %v3170_v15 = vadd.f32 %v580_v13, %v456_v48  ;;  %v582_v16 = vpop.f32.mrb[9].mxu0  ;;  %v3173_v17 = vadd.f32 %v653_v14, %v3132_v44  ;;  %v655_v18 = vpop.f32.mrb[9].mxu1  ;;  %v636_v13 = vadd.f32 %v635_v50, %v3138_v47 }
 0x1a6   : > { %v3175_v20 = vadd.f32 %v582_v16, %v460_v51  ;;  %v584_v25 = vpop.f32.mrb[10].mxu0  ;;  %v3178_v26 = vadd.f32 %v655_v18, %v3138_v47  ;;  %v657_v30 = vpop.f32.mrb[10].mxu1 }
 0x1a7   : > { %v3180_v31 = vadd.f32 %v584_v25, %v456_v48  ;;  %v586_v32 = vpop.f32.mrb[11].mxu0  ;;  %v3183_v33 = vadd.f32 %v657_v30, %v3132_v44  ;;  %v659_v34 = vpop.f32.mrb[11].mxu1 }
 0x1a8   : > { %v3185_v35 = vadd.f32 %v586_v32, %v460_v51  ;;  %v3188_v36 = vadd.f32 %v659_v34, %v3138_v47 }
 0x1ac   : > { %v590_v37 = vpop.f32.mrb[12].mxu0  ;;  %v663_v38 = vpop.f32.mrb[12].mxu1 }
 0x1ad   : > { %v3190_v39 = vadd.f32 %v590_v37, %v456_v48  ;;  %v592_v40 = vpop.f32.mrb[13].mxu0  ;;  %v3193_v41 = vadd.f32 %v663_v38, %v3132_v44  ;;  %v665_v42 = vpop.f32.mrb[13].mxu1 }
 0x1ae   : > { %v3195_v43 = vadd.f32 %v592_v40, %v460_v51  ;;  %v594_v52 = vpop.f32.mrb[14].mxu0  ;;  %v3198_v53 = vadd.f32 %v665_v42, %v3138_v47  ;;  %v667_v55 = vpop.f32.mrb[14].mxu1 }
 0x1af   : > { %v3200_v57 = vadd.f32 %v594_v52, %v456_v48  ;;  %v596_v60 = vpop.f32.mrb[15].mxu0  ;;  %v3203_v61 = vadd.f32 %v667_v55, %v3132_v44  ;;  %v669_v63 = vpop.f32.mrb[15].mxu1 }
 0x1b0   : > { %v3205_v1 = vadd.f32 %v596_v60, %v460_v51  ;;  %v3208_v3 = vadd.f32 %v669_v63, %v3138_v47 }
 0x1b4   : > { %v793_v14 = vpop.f32.mrb[16].mxu0  ;;  %v834_v16 = vpop.f32.mrb[16].mxu1 }
 0x1b5   : > { %v841_v18 = vadd.f32 %v793_v14, %v561_v5  ;;  %v843_v25 = vadd.f32 %v834_v16, %v634_v7  ;;  %v795_v30 = vpop.f32.mrb[17].mxu0  ;;  %v836_v32 = vpop.f32.mrb[17].mxu1 }
 0x1b6   : > { %v842_v34 = vadd.f32 %v795_v30, %v563_v9  ;;  %v844_v37 = vadd.f32 %v836_v32, %v636_v13  ;;  %v797_v38 = vpop.f32.mrb[18].mxu0  ;;  %v838_v40 = vpop.f32.mrb[18].mxu1 }
 0x1b7   : > { %v2082_v42 = vmul.f32 -1.442695, %v841_v18  ;;  %v798_v52 = vpop.f32.mrb[19].mxu0  ;;  %v839_v55 = vpop.f32.mrb[19].mxu1  ;;  %v2084_v44 = vmul.f32 -1.442695, %v843_v25 }
 0x1b8   : > { %v2083_v45 = vmul.f32 -1.442695, %v842_v34 }
 0x1b9   : > { %2413 = vpow2.f32 %v2082_v42 }
 0x1ba   : > { %2415 = vpow2.f32 %v2083_v45 }
 0x1bb   : > { %2417 = vtanh.f32 %v844_v37 }
 0x1bc   : > { %2419 = vpow2.f32 %v2084_v44 }
 0x1c3   : > { %v2414_v46 = vpop.eup %2413 }
 0x1c4   : > { %v854_v48 = vadd.f32 1.0, %v2414_v46  ;;  %v2416_v47 = vpop.eup %2415 }
 0x1c5   : > { %v855_v49 = vadd.f32 1.0, %v2416_v47  ;;  %v2418_v50 = vpop.eup %2417 }
 0x1c6   : > { %2421 = vrcp.f32 %v854_v48  ;;  %v2420_v51 = vpop.eup %2419 }
 0x1c7   : > { %2423 = vrcp.f32 %v855_v49  ;;  %v856_v7 = vadd.f32 1.0, %v2420_v51 }
 0x1c9   : > { %2425 = vrcp.f32 %v856_v7 }
 0x1d0   : > { %v2422_v60 = vpop.eup %2421 }
 0x1d1   : > { %v865_v63 = vmul.f32 %v2422_v60, %v2418_v50  ;;  %v2424_v5 = vpop.eup %2423 }
 0x1d2   : > { %v864_v9 = vmul.f32 0.0, %v2424_v5 }
 0x1d3   : > { %v2426_v14 = vpop.eup %2425 }
 0x1d4   : > { %v866_v13 = vadd.f32 %v865_v63, %v864_v9 }
 0x1d6   : > { %2427 = vtanh.f32 %v866_v13 }
 0x1e0   : > { %v2428_v16 = vpop.eup %2427 }
 0x1e1   : > { %v868_v18 = vmul.f32 %v2428_v16, %v2426_v14 }
 0x1e3   : > { %869 = vst [vmem:[#allocation2] sm:$0xff] %v868_v18  ;;  %v874_v25 = vpack.c.bf16 %v868_v18, %v868_v18 }
 0x1e5   : > { %2085 = vmatmul.mubr.msk.bf16.vlgmr.msra.gmra.mrb[20].mxu0 %vm513_vm0, %v874_v25  ;;  %2086 = vmatmul.mubr.msk.bf16.vlgmr.msra.gmra.mrb[20].mxu1 %vm513_vm0, %v874_v25 }
 0x1e6   : > { %998 = vmatpush1.bf16.msra.mxu0 %v3073_v21  ;;  %1039 = vmatpush1.bf16.msra.mxu1 %v3084_v24 }
 0x1e7   : > { %999 = vmatprep.subr.bf16.mxu0 %v3081_v23  ;;  %1040 = vmatprep.subr.bf16.mxu1 %v3094_v28 }
 0x1e8   : > { %1029 = vmatprep.mubr.bf16.mxu0 %v2768_v10  ;;  %1070 = vmatprep.mubr.bf16.mxu1 %v2768_v10 }
 0x1ea   : > { %1000 = vmatpush1.bf16.msra.mxu0 %v3089_v27  ;;  %1041 = vmatpush1.bf16.msra.mxu1 %v3100_v29 }
 0x1eb   : > { %1116 = vmatprep.subr.bf16.mxu0 %v3070_v19  ;;  %1157 = vmatprep.subr.bf16.mxu1 %v3076_v22 }
 0x2b8   : > { %v912_v30 = vpop.f32.mrb[20].mxu0  ;;  %v953_v32 = vpop.f32.mrb[20].mxu1 }
 0x2b9   : > { %v960_v34 = vadd.f32 %v912_v30, %v3140_v54  ;;  %v962_v37 = vadd.f32 %v953_v32, %v3143_v56  ;;  %v914_v38 = vpop.f32.mrb[21].mxu0  ;;  %v955_v40 = vpop.f32.mrb[21].mxu1 }
 0x2ba   : > { %v961_v42 = vadd.f32 %v914_v38, %v3145_v58  ;;  %v963_v52 = vadd.f32 %v955_v40, %v3148_v59  ;;  %v916_v55 = vpop.f32.mrb[22].mxu0  ;;  %v957_v45 = vpop.f32.mrb[22].mxu1 }
 0x2bb   : > { %v2087_v44 = vmul.f32 -1.442695, %v960_v34  ;;  %v917_v46 = vpop.f32.mrb[23].mxu0  ;;  %v958_v48 = vpop.f32.mrb[23].mxu1  ;;  %v2089_v49 = vmul.f32 -1.442695, %v962_v37 }
 0x2bc   : > { %v2088_v47 = vmul.f32 -1.442695, %v961_v42 }
 0x2bd   : > { %2429 = vpow2.f32 %v2087_v44 }
 0x2be   : > { %2431 = vpow2.f32 %v2088_v47 }
 0x2bf   : > { %2433 = vtanh.f32 %v963_v52 }
 0x2c0   : > { %2435 = vpow2.f32 %v2089_v49 }
 0x2c7   : > { %v2430_v50 = vpop.eup %2429 }
 0x2c8   : > { %v973_v51 = vadd.f32 1.0, %v2430_v50  ;;  %v2432_v54 = vpop.eup %2431 }
 0x2c9   : > { %v974_v56 = vadd.f32 1.0, %v2432_v54  ;;  %v2434_v58 = vpop.eup %2433 }
 0x2ca   : > { %2437 = vrcp.f32 %v973_v51  ;;  %v2436_v60 = vpop.eup %2435 }
 0x2cb   : > { %2439 = vrcp.f32 %v974_v56  ;;  %v975_v7 = vadd.f32 1.0, %v2436_v60 }
 0x2cd   : > { %2441 = vrcp.f32 %v975_v7 }
 0x2d4   : > { %v2438_v59 = vpop.eup %2437 }
 0x2d5   : > { %v984_v63 = vmul.f32 %v2438_v59, %v2434_v58  ;;  %v2440_v5 = vpop.eup %2439 }
 0x2d6   : > { %v983_v9 = vmul.f32 %v2440_v5, %v866_v13 }
 0x2d7   : > { %v2442_v16 = vpop.eup %2441 }
 0x2d8   : > { %v985_v14 = vadd.f32 %v984_v63, %v983_v9 }
 0x2da   : > { %2443 = vtanh.f32 %v985_v14 }
 0x2e4   : > { %v2444_v18 = vpop.eup %2443 }
 0x2e5   : > { %v987_v25 = vmul.f32 %v2444_v18, %v2442_v16 }
 0x2e7   : > { %988 = vst [vmem:[#allocation2 + $0x8] sm:$0xff] %v987_v25  ;;  %v993_v30 = vpack.c.bf16 %v987_v25, %v987_v25 }
 0x2e9   : > { %2090 = vmatmul.mubr.msk.bf16.vlgmr.msra.gmra.mrb[24].mxu0 %vm513_vm0, %v993_v30  ;;  %2091 = vmatmul.mubr.msk.bf16.vlgmr.msra.gmra.mrb[24].mxu1 %vm513_vm0, %v993_v30 }
 0x2ea   : > { %1117 = vmatpush1.bf16.msra.mxu0 %v3073_v21  ;;  %1158 = vmatpush1.bf16.msra.mxu1 %v3084_v24 }
 0x2eb   : > { %1118 = vmatprep.subr.bf16.mxu0 %v3081_v23  ;;  %1159 = vmatprep.subr.bf16.mxu1 %v3094_v28 }
 0x2ec   : > { %1148 = vmatprep.mubr.bf16.mxu0 %v2768_v10  ;;  %1189 = vmatprep.mubr.bf16.mxu1 %v2768_v10 }
 0x2ee   : > { %1119 = vmatpush1.bf16.msra.mxu0 %v3089_v27  ;;  %1160 = vmatpush1.bf16.msra.mxu1 %v3100_v29 }
 0x2ef   : > { %1235 = vmatprep.subr.bf16.mxu0 %v3070_v19  ;;  %1276 = vmatprep.subr.bf16.mxu1 %v3076_v22 }
 0x3bc   : > { %v1031_v13 = vpop.f32.mrb[24].mxu0  ;;  %v1072_v32 = vpop.f32.mrb[24].mxu1 }
 0x3bd   : > { %v1079_v34 = vadd.f32 %v1031_v13, %v3150_v62  ;;  %v1081_v37 = vadd.f32 %v1072_v32, %v3153_v0  ;;  %v1033_v38 = vpop.f32.mrb[25].mxu0  ;;  %v1074_v40 = vpop.f32.mrb[25].mxu1 }
 0x3be   : > { %v1080_v42 = vadd.f32 %v1033_v38, %v3155_v2  ;;  %v1082_v52 = vadd.f32 %v1074_v40, %v3158_v4  ;;  %v1035_v55 = vpop.f32.mrb[26].mxu0  ;;  %v1076_v45 = vpop.f32.mrb[26].mxu1 }
 0x3bf   : > { %v2092_v44 = vmul.f32 -1.442695, %v1079_v34  ;;  %v1036_v46 = vpop.f32.mrb[27].mxu0  ;;  %v1077_v48 = vpop.f32.mrb[27].mxu1  ;;  %v2094_v49 = vmul.f32 -1.442695, %v1081_v37 }
 0x3c0   : > { %v2093_v47 = vmul.f32 -1.442695, %v1080_v42 }
 0x3c1   : > { %2445 = vpow2.f32 %v2092_v44 }
 0x3c2   : > { %2447 = vpow2.f32 %v2093_v47 }
 0x3c3   : > { %2449 = vtanh.f32 %v1082_v52 }
 0x3c4   : > { %2451 = vpow2.f32 %v2094_v49 }
 0x3cb   : > { %v2446_v50 = vpop.eup %2445 }
 0x3cc   : > { %v1092_v51 = vadd.f32 1.0, %v2446_v50  ;;  %v2448_v62 = vpop.eup %2447 }
 0x3cd   : > { %v1093_v0 = vadd.f32 1.0, %v2448_v62  ;;  %v2450_v2 = vpop.eup %2449 }
 0x3ce   : > { %2453 = vrcp.f32 %v1092_v51  ;;  %v2452_v54 = vpop.eup %2451 }
 0x3cf   : > { %2455 = vrcp.f32 %v1093_v0  ;;  %v1094_v60 = vadd.f32 1.0, %v2452_v54 }
 0x3d1   : > { %2457 = vrcp.f32 %v1094_v60 }
 0x3d8   : > { %v2454_v4 = vpop.eup %2453 }
 0x3d9   : > { %v1103_v56 = vmul.f32 %v2454_v4, %v2450_v2  ;;  %v2456_v58 = vpop.eup %2455 }
 0x3da   : > { %v1102_v59 = vmul.f32 %v2456_v58, %v985_v14 }
 0x3db   : > { %v2458_v5 = vpop.eup %2457 }
 0x3dc   : > { %v1104_v63 = vadd.f32 %v1103_v56, %v1102_v59 }
 0x3de   : > { %2459 = vtanh.f32 %v1104_v63 }
 0x3e8   : > { %v2460_v7 = vpop.eup %2459 }
 0x3e9   : > { %v1106_v9 = vmul.f32 %v2460_v7, %v2458_v5 }
 0x3eb   : > { %1107 = vst [vmem:[#allocation2 + $0x10] sm:$0xff] %v1106_v9  ;;  %v1112_v16 = vpack.c.bf16 %v1106_v9, %v1106_v9 }
 0x3ed   : > { %2095 = vmatmul.mubr.msk.bf16.vlgmr.msra.gmra.mrb[28].mxu0 %vm513_vm0, %v1112_v16  ;;  %2096 = vmatmul.mubr.msk.bf16.vlgmr.msra.gmra.mrb[28].mxu1 %vm513_vm0, %v1112_v16 }
 0x3ee   : > { %1236 = vmatpush1.bf16.msra.mxu0 %v3073_v21  ;;  %1277 = vmatpush1.bf16.msra.mxu1 %v3084_v24 }
 0x3ef   : > { %1237 = vmatprep.subr.bf16.mxu0 %v3081_v23  ;;  %1278 = vmatprep.subr.bf16.mxu1 %v3094_v28 }
 0x3f0   : > { %1267 = vmatprep.mubr.bf16.mxu0 %v2768_v10  ;;  %1308 = vmatprep.mubr.bf16.mxu1 %v2768_v10 }
 0x3f2   : > { %1238 = vmatpush1.bf16.msra.mxu0 %v3089_v27  ;;  %1279 = vmatpush1.bf16.msra.mxu1 %v3100_v29 }
 0x3f3   : > { %1354 = vmatprep.subr.bf16.mxu0 %v3070_v19  ;;  %1395 = vmatprep.subr.bf16.mxu1 %v3076_v22 }
 0x4c0   : > { %v1150_v14 = vpop.f32.mrb[28].mxu0  ;;  %v1191_v18 = vpop.f32.mrb[28].mxu1 }
 0x4c1   : > { %v1198_v25 = vadd.f32 %v1150_v14, %v3160_v6  ;;  %v1200_v30 = vadd.f32 %v1191_v18, %v3163_v8  ;;  %v1152_v13 = vpop.f32.mrb[29].mxu0  ;;  %v1193_v32 = vpop.f32.mrb[29].mxu1 }
 0x4c2   : > { %v1199_v34 = vadd.f32 %v1152_v13, %v3165_v11  ;;  %v1201_v37 = vadd.f32 %v1193_v32, %v3168_v12  ;;  %v1154_v38 = vpop.f32.mrb[30].mxu0  ;;  %v1195_v40 = vpop.f32.mrb[30].mxu1 }
 0x4c3   : > { %v2097_v42 = vmul.f32 -1.442695, %v1198_v25  ;;  %v1155_v52 = vpop.f32.mrb[31].mxu0  ;;  %v1196_v55 = vpop.f32.mrb[31].mxu1  ;;  %v2099_v44 = vmul.f32 -1.442695, %v1200_v30 }
 0x4c4   : > { %v2098_v45 = vmul.f32 -1.442695, %v1199_v34 }
 0x4c5   : > { %2461 = vpow2.f32 %v2097_v42 }
 0x4c6   : > { %2463 = vpow2.f32 %v2098_v45 }
 0x4c7   : > { %2465 = vtanh.f32 %v1201_v37 }
 0x4c8   : > { %2467 = vpow2.f32 %v2099_v44 }
 0x4cf   : > { %v2462_v46 = vpop.eup %2461 }
 0x4d0   : > { %v1211_v48 = vadd.f32 1.0, %v2462_v46  ;;  %v2464_v6 = vpop.eup %2463 }
 0x4d1   : > { %v1212_v8 = vadd.f32 1.0, %v2464_v6  ;;  %v2466_v11 = vpop.eup %2465 }
 0x4d2   : > { %2469 = vrcp.f32 %v1211_v48  ;;  %v2468_v47 = vpop.eup %2467 }
 0x4d3   : > { %2471 = vrcp.f32 %v1212_v8  ;;  %v1213_v51 = vadd.f32 1.0, %v2468_v47 }
 0x4d5   : > { %2473 = vrcp.f32 %v1213_v51 }
 0x4dc   : > { %v2470_v12 = vpop.eup %2469 }
 0x4dd   : > { %v1222_v49 = vmul.f32 %v2470_v12, %v2466_v11  ;;  %v2472_v50 = vpop.eup %2471 }
 0x4de   : > { %v1221_v62 = vmul.f32 %v2472_v50, %v1104_v63 }
 0x4df   : > { %v2474_v2 = vpop.eup %2473 }
 0x4e0   : > { %v1223_v0 = vadd.f32 %v1222_v49, %v1221_v62 }
 0x4e2   : > { %2475 = vtanh.f32 %v1223_v0 }
 0x4ec   : > { %v2476_v54 = vpop.eup %2475 }
 0x4ed   : > { %v1225_v4 = vmul.f32 %v2476_v54, %v2474_v2 }
 0x4ef   : > { %1226 = vst [vmem:[#allocation2 + $0x18] sm:$0xff] %v1225_v4  ;;  %v1231_v56 = vpack.c.bf16 %v1225_v4, %v1225_v4 }
 0x4f1   : > { %2100 = vmatmul.mubr.msk.bf16.vlgmr.msra.gmra.mrb[32].mxu0 %vm513_vm0, %v1231_v56  ;;  %2101 = vmatmul.mubr.msk.bf16.vlgmr.msra.gmra.mrb[32].mxu1 %vm513_vm0, %v1231_v56 }
 0x4f2   : > { %1355 = vmatpush1.bf16.msra.mxu0 %v3073_v21  ;;  %1396 = vmatpush1.bf16.msra.mxu1 %v3084_v24 }
 0x4f3   : > { %1356 = vmatprep.subr.bf16.mxu0 %v3081_v23  ;;  %1397 = vmatprep.subr.bf16.mxu1 %v3094_v28 }
 0x4f4   : > { %1386 = vmatprep.mubr.bf16.mxu0 %v2768_v10  ;;  %1427 = vmatprep.mubr.bf16.mxu1 %v2768_v10 }
 0x4f6   : > { %1357 = vmatpush1.bf16.msra.mxu0 %v3089_v27  ;;  %1398 = vmatpush1.bf16.msra.mxu1 %v3100_v29 }
 0x4f7   : > { %1473 = vmatprep.subr.bf16.mxu0 %v3070_v19  ;;  %1514 = vmatprep.subr.bf16.mxu1 %v3076_v22 }
 0x5c4   : > { %v1269_v58 = vpop.f32.mrb[32].mxu0  ;;  %v1310_v60 = vpop.f32.mrb[32].mxu1 }
 0x5c5   : > { %v1317_v59 = vadd.f32 %v1269_v58, %v3170_v15  ;;  %v1319_v63 = vadd.f32 %v1310_v60, %v3173_v17  ;;  %v1271_v5 = vpop.f32.mrb[33].mxu0  ;;  %v1312_v7 = vpop.f32.mrb[33].mxu1 }
 0x5c6   : > { %v1318_v9 = vadd.f32 %v1271_v5, %v3175_v20  ;;  %v1320_v16 = vadd.f32 %v1312_v7, %v3178_v26  ;;  %v1273_v14 = vpop.f32.mrb[34].mxu0  ;;  %v1314_v18 = vpop.f32.mrb[34].mxu1 }
 0x5c7   : > { %v2102_v25 = vmul.f32 -1.442695, %v1317_v59  ;;  %v1274_v30 = vpop.f32.mrb[35].mxu0  ;;  %v1315_v13 = vpop.f32.mrb[35].mxu1  ;;  %v2104_v34 = vmul.f32 -1.442695, %v1319_v63 }
 0x5c8   : > { %v2103_v32 = vmul.f32 -1.442695, %v1318_v9 }
 0x5c9   : > { %2477 = vpow2.f32 %v2102_v25 }
 0x5ca   : > { %2479 = vpow2.f32 %v2103_v32 }
 0x5cb   : > { %2481 = vtanh.f32 %v1320_v16 }
 0x5cc   : > { %2483 = vpow2.f32 %v2104_v34 }
 0x5d3   : > { %v2478_v37 = vpop.eup %2477 }
 0x5d4   : > { %v1330_v38 = vadd.f32 1.0, %v2478_v37  ;;  %v2480_v15 = vpop.eup %2479 }
 0x5d5   : > { %v1331_v17 = vadd.f32 1.0, %v2480_v15  ;;  %v2482_v20 = vpop.eup %2481 }
 0x5d6   : > { %2485 = vrcp.f32 %v1330_v38  ;;  %v2484_v40 = vpop.eup %2483 }
 0x5d7   : > { %2487 = vrcp.f32 %v1331_v17  ;;  %v1332_v55 = vadd.f32 1.0, %v2484_v40 }
 0x5d9   : > { %2489 = vrcp.f32 %v1332_v55 }
 0x5e0   : > { %v2486_v26 = vpop.eup %2485 }
 0x5e1   : > { %v1341_v42 = vmul.f32 %v2486_v26, %v2482_v20  ;;  %v2488_v52 = vpop.eup %2487 }
 0x5e2   : > { %v1340_v45 = vmul.f32 %v2488_v52, %v1223_v0 }
 0x5e3   : > { %v2490_v46 = vpop.eup %2489 }
 0x5e4   : > { %v1342_v44 = vadd.f32 %v1341_v42, %v1340_v45 }
 0x5e6   : > { %2491 = vtanh.f32 %v1342_v44 }
 0x5f0   : > { %v2492_v48 = vpop.eup %2491 }
 0x5f1   : > { %v1344_v6 = vmul.f32 %v2492_v48, %v2490_v46 }
 0x5f3   : > { %1345 = vst [vmem:[#allocation2 + $0x20] sm:$0xff] %v1344_v6  ;;  %v1350_v8 = vpack.c.bf16 %v1344_v6, %v1344_v6 }
 0x5f5   : > { %2105 = vmatmul.mubr.msk.bf16.vlgmr.msra.gmra.mrb[36].mxu0 %vm513_vm0, %v1350_v8  ;;  %2106 = vmatmul.mubr.msk.bf16.vlgmr.msra.gmra.mrb[36].mxu1 %vm513_vm0, %v1350_v8 }
 0x5f6   : > { %1474 = vmatpush1.bf16.msra.mxu0 %v3073_v21  ;;  %1515 = vmatpush1.bf16.msra.mxu1 %v3084_v24 }
 0x5f7   : > { %1475 = vmatprep.subr.bf16.mxu0 %v3081_v23  ;;  %1516 = vmatprep.subr.bf16.mxu1 %v3094_v28 }
 0x5f8   : > { %1505 = vmatprep.mubr.bf16.mxu0 %v2768_v10  ;;  %1546 = vmatprep.mubr.bf16.mxu1 %v2768_v10 }
 0x5fa   : > { %1476 = vmatpush1.bf16.msra.mxu0 %v3089_v27  ;;  %1517 = vmatpush1.bf16.msra.mxu1 %v3100_v29 }
 0x5fb   : > { %1592 = vmatprep.subr.bf16.mxu0 %v3070_v19  ;;  %1633 = vmatprep.subr.bf16.mxu1 %v3076_v22 }
 0x6c8   : > { %v1388_v11 = vpop.f32.mrb[36].mxu0  ;;  %v1429_v47 = vpop.f32.mrb[36].mxu1 }
 0x6c9   : > { %v1436_v12 = vadd.f32 %v1388_v11, %v3180_v31  ;;  %v1438_v49 = vadd.f32 %v1429_v47, %v3183_v33  ;;  %v1390_v50 = vpop.f32.mrb[37].mxu0  ;;  %v1431_v51 = vpop.f32.mrb[37].mxu1 }
 0x6ca   : > { %v1437_v62 = vadd.f32 %v1390_v50, %v3185_v35  ;;  %v1439_v0 = vadd.f32 %v1431_v51, %v3188_v36  ;;  %v1392_v2 = vpop.f32.mrb[38].mxu0  ;;  %v1433_v54 = vpop.f32.mrb[38].mxu1 }
 0x6cb   : > { %v2107_v4 = vmul.f32 -1.442695, %v1436_v12  ;;  %v1393_v56 = vpop.f32.mrb[39].mxu0  ;;  %v1434_v58 = vpop.f32.mrb[39].mxu1  ;;  %v2109_v22 = vmul.f32 -1.442695, %v1438_v49 }
 0x6cc   : > { %v2108_v19 = vmul.f32 -1.442695, %v1437_v62 }
 0x6cd   : > { %2493 = vpow2.f32 %v2107_v4 }
 0x6ce   : > { %2495 = vpow2.f32 %v2108_v19 }
 0x6cf   : > { %2497 = vtanh.f32 %v1439_v0 }
 0x6d0   : > { %2499 = vpow2.f32 %v2109_v22 }
 0x6d7   : > { %v2494_v60 = vpop.eup %2493 }
 0x6d8   : > { %v1449_v59 = vadd.f32 1.0, %v2494_v60  ;;  %v2496_v31 = vpop.eup %2495 }
 0x6d9   : > { %v1450_v33 = vadd.f32 1.0, %v2496_v31  ;;  %v2498_v35 = vpop.eup %2497 }
 0x6da   : > { %2501 = vrcp.f32 %v1449_v59  ;;  %v2500_v63 = vpop.eup %2499 }
 0x6db   : > { %2503 = vrcp.f32 %v1450_v33  ;;  %v1451_v9 = vadd.f32 1.0, %v2500_v63 }
 0x6dd   : > { %2505 = vrcp.f32 %v1451_v9 }
 0x6e4   : > { %v2502_v36 = vpop.eup %2501 }
 0x6e5   : > { %v1460_v5 = vmul.f32 %v2502_v36, %v2498_v35  ;;  %v2504_v7 = vpop.eup %2503 }
 0x6e6   : > { %v1459_v16 = vmul.f32 %v2504_v7, %v1342_v44 }
 0x6e7   : > { %v2506_v18 = vpop.eup %2505 }
 0x6e8   : > { %v1461_v14 = vadd.f32 %v1460_v5, %v1459_v16 }
 0x6ea   : > { %2507 = vtanh.f32 %v1461_v14 }
 0x6f4   : > { %v2508_v25 = vpop.eup %2507 }
 0x6f5   : > { %v1463_v30 = vmul.f32 %v2508_v25, %v2506_v18  ;;  %v1714_v25 = vld [vmem:[#allocation11] sm:$0xff] (!%p2121_p1) }
 0x6f7   : > { %1464 = vst [vmem:[#allocation2 + $0x28] sm:$0xff] %v1463_v30  ;;  %v1469_v13 = vpack.c.bf16 %v1463_v30, %v1463_v30  ;;  %v1715_v30 = vld [vmem:[#allocation11 + $0x8] sm:$0xff] (!%p2121_p1) }
 0x6f9   : > { %2110 = vmatmul.mubr.msk.bf16.vlgmr.msra.gmra.mrb[40].mxu0 %vm513_vm0, %v1469_v13  ;;  %2111 = vmatmul.mubr.msk.bf16.vlgmr.msra.gmra.mrb[40].mxu1 %vm513_vm0, %v1469_v13  ;;  %v1716_v13 = vld [vmem:[#allocation11 + $0x10] sm:$0xff] (!%p2121_p1) }
 0x6fa   : > { %1593 = vmatpush1.bf16.msra.mxu0 %v3073_v21  ;;  %1634 = vmatpush1.bf16.msra.mxu1 %v3084_v24 }
 0x6fb   : > { %1594 = vmatprep.subr.bf16.mxu0 %v3081_v23  ;;  %1635 = vmatprep.subr.bf16.mxu1 %v3094_v28 }
 0x6fc   : > { %1624 = vmatprep.mubr.bf16.mxu0 %v2768_v10  ;;  %1665 = vmatprep.mubr.bf16.mxu1 %v2768_v10 }
 0x6fe   : > { %1595 = vmatpush1.bf16.msra.mxu0 %v3089_v27  ;;  %1636 = vmatpush1.bf16.msra.mxu1 %v3100_v29 }
 0x7cc   : > { %v1507_v32 = vpop.f32.mrb[40].mxu0  ;;  %v1548_v34 = vpop.f32.mrb[40].mxu1 }
 0x7cd   : > { %v1555_v37 = vadd.f32 %v1507_v32, %v3190_v39  ;;  %v1557_v21 = vadd.f32 %v1548_v34, %v3193_v41  ;;  %v1509_v38 = vpop.f32.mrb[41].mxu0  ;;  %v1550_v24 = vpop.f32.mrb[41].mxu1  ;;  %v2236_v32 = vpack.c.bf16 (!%p2121_p1), %v1715_v30, %v1714_v25  ;;  %v1717_v34 = vld [vmem:[#allocation11 + $0x18] sm:$0xff] (!%p2121_p1) }
 0x7ce   : > { %v1556_v23 = vadd.f32 %v1509_v38, %v3195_v43  ;;  %v1558_v28 = vadd.f32 %v1550_v24, %v3198_v53  ;;  %v1511_v15 = vpop.f32.mrb[42].mxu0  ;;  %v1552_v17 = vpop.f32.mrb[42].mxu1  ;;  %v1719_v38 = vld [vmem:[#allocation11 + $0x28] sm:$0xff] (!%p2121_p1) }
 0x7cf   : > { %v2112_v20 = vmul.f32 -1.442695, %v1555_v37  ;;  %v1512_v10 = vpop.f32.mrb[43].mxu0  ;;  %v1553_v40 = vpop.f32.mrb[43].mxu1  ;;  %v2114_v29 = vmul.f32 -1.442695, %v1557_v21  ;;  %v2240_v37 = vpack.c.bf16 (!%p2121_p1), %v1717_v34, %v1716_v13  ;;  %2237 = vmatprep.subr.bf16.mxu0 (!%p2121_p1), %v2236_v32 }
 0x7d0   : > { %v2113_v27 = vmul.f32 -1.442695, %v1556_v23  ;;  %v1718_v21 = vld [vmem:[#allocation11 + $0x20] sm:$0xff] (!%p2121_p1)  ;;  %v1720_v23 = vld [vmem:[#allocation11 + $0x30] sm:$0xff] (!%p2121_p1)  ;;  %v1815_v10 = vld [vmem:[#allocation13 + $0x8] sm:$0xff] (!%p2121_p1) }
 0x7d1   : > { %2509 = vpow2.f32 %v2112_v20  ;;  %v2244_v24 = vpack.c.bf16 (!%p2121_p1), %v1719_v38, %v1718_v21  ;;  %v1814_v20 = vld [vmem:[#allocation13] sm:$0xff] (!%p2121_p1)  ;;  %v1816_v40 = vld [vmem:[#allocation13 + $0x10] sm:$0xff] (!%p2121_p1) }
 0x7d2   : > { %2511 = vpow2.f32 %v2113_v27  ;;  %v2268_v27 = vpack.c.bf16 (!%p2121_p1), %v1815_v10, %v1814_v20 }
 0x7d3   : > { %2513 = vtanh.f32 %v1558_v28  ;;  %v1721_v28 = vld [vmem:[#allocation11 + $0x38] sm:$0xff] (!%p2121_p1) }
 0x7d4   : > { %2515 = vpow2.f32 %v2114_v29  ;;  %v1817_v29 = vld [vmem:[#allocation13 + $0x18] sm:$0xff] (!%p2121_p1)  ;;  %2269 = vmatprep.subr.bf16.mxu1 (!%p2121_p1), %v2268_v27 }
 0x7db   : > { %v2510_v26 = vpop.eup %2509 }
 0x7dc   : > { %v1568_v42 = vadd.f32 1.0, %v2510_v26  ;;  %v2512_v39 = vpop.eup %2511  ;;  %v2272_v26 = vpack.c.bf16 (!%p2121_p1), %v1817_v29, %v1816_v40 }
 0x7dd   : > { %v1569_v41 = vadd.f32 1.0, %v2512_v39  ;;  %v2514_v43 = vpop.eup %2513  ;;  %v1819_v39 = vld [vmem:[#allocation13 + $0x28] sm:$0xff] (!%p2121_p1) }
 0x7de   : > { %2517 = vrcp.f32 %v1568_v42  ;;  %v2516_v52 = vpop.eup %2515  ;;  %v1818_v42 = vld [vmem:[#allocation13 + $0x20] sm:$0xff] (!%p2121_p1) }
 0x7df   : > { %2519 = vrcp.f32 %v1569_v41  ;;  %v1570_v44 = vadd.f32 1.0, %v2516_v52  ;;  %v2248_v41 = vpack.c.bf16 (!%p2121_p1), %v1721_v28, %v1720_v23  ;;  %v1723_v52 = vld [vmem:[#allocation11 + $0x48] sm:$0xff] (!%p2121_p1) }
 0x7e1   : > { %2521 = vrcp.f32 %v1570_v44 }
 0x7e8   : > { %v2518_v53 = vpop.eup %2517 }
 0x7e9   : > { %v1579_v55 = vmul.f32 %v2518_v53, %v2514_v43  ;;  %v2520_v45 = vpop.eup %2519  ;;  %v1722_v43 = vld [vmem:[#allocation11 + $0x40] sm:$0xff] (!%p2121_p1)  ;;  %v2276_v53 = vpack.c.bf16 (!%p2121_p1), %v1819_v39, %v1818_v42 }
 0x7ea   : > { %v1578_v46 = vmul.f32 %v2520_v45, %v1461_v14  ;;  %v1821_v45 = vld [vmem:[#allocation13 + $0x38] sm:$0xff] (!%p2121_p1)  ;;  %v2252_v44 = vpack.c.bf16 (!%p2121_p1), %v1723_v52, %v1722_v43 }
 0x7eb   : > { %v2522_v6 = vpop.eup %2521 }
 0x7ec   : > { %v1580_v48 = vadd.f32 %v1579_v55, %v1578_v46  ;;  %v1820_v55 = vld [vmem:[#allocation13 + $0x30] sm:$0xff] (!%p2121_p1) }
 0x7ed   : > { %v1724_v46 = vld [vmem:[#allocation11 + $0x50] sm:$0xff] (!%p2121_p1) }
 0x7ee   : > { %2523 = vtanh.f32 %v1580_v48 }
 0x7f8   : > { %v2524_v8 = vpop.eup %2523 }
 0x7f9   : > { %v1582_v11 = vmul.f32 %v2524_v8, %v2522_v6  ;;  %v2280_v6 = vpack.c.bf16 (!%p2121_p1), %v1821_v45, %v1820_v55  ;;  %v1822_v8 = vld [vmem:[#allocation13 + $0x40] sm:$0xff] (!%p2121_p1) }
 0x7fb   : > { %1583 = vst [vmem:[#allocation2 + $0x30] sm:$0xff] %v1582_v11  ;;  %v1588_v47 = vpack.c.bf16 %v1582_v11, %v1582_v11  ;;  %v1823_v11 = vld [vmem:[#allocation13 + $0x48] sm:$0xff] (!%p2121_p1) }
 0x7fd   : > { %2115 = vmatmul.mubr.msk.bf16.vlgmr.msra.gmra.mrb[44].mxu0 %vm513_vm0, %v1588_v47  ;;  %2116 = vmatmul.mubr.msk.bf16.vlgmr.msra.gmra.mrb[44].mxu1 %vm513_vm0, %v1588_v47 }
 0x7fe   : > { %2239 = vmatpush3.bf16.msra.mxu0 (!%p2121_p1), %v2236_v32  ;;  %2271 = vmatpush3.bf16.msra.mxu1 (!%p2121_p1), %v2268_v27 }
 0x7ff   : > { %2241 = vmatprep.subr.bf16.mxu0 (!%p2121_p1), %v2240_v37  ;;  %2273 = vmatprep.subr.bf16.mxu1 (!%p2121_p1), %v2272_v26 }
 0x802   : > { %2243 = vmatpush3.bf16.msra.mxu0 (!%p2121_p1), %v2240_v37  ;;  %2275 = vmatpush3.bf16.msra.mxu1 (!%p2121_p1), %v2272_v26 }
 0x803   : > { %2245 = vmatprep.subr.bf16.mxu0 (!%p2121_p1), %v2244_v24  ;;  %2277 = vmatprep.subr.bf16.mxu1 (!%p2121_p1), %v2276_v53 }
 0x806   : > { %2247 = vmatpush3.bf16.msra.mxu0 (!%p2121_p1), %v2244_v24  ;;  %2279 = vmatpush3.bf16.msra.mxu1 (!%p2121_p1), %v2276_v53 }
 0x807   : > { %2249 = vmatprep.subr.bf16.mxu0 (!%p2121_p1), %v2248_v41  ;;  %2281 = vmatprep.subr.bf16.mxu1 (!%p2121_p1), %v2280_v6 }
 0x80a   : > { %2251 = vmatpush3.bf16.msra.mxu0 (!%p2121_p1), %v2248_v41  ;;  %2283 = vmatpush3.bf16.msra.mxu1 (!%p2121_p1), %v2280_v6 }
 0x80b   : > { %2253 = vmatprep.subr.bf16.mxu0 (!%p2121_p1), %v2252_v44 }
 0x80e   : > { %2255 = vmatpush3.bf16.msra.mxu0 (!%p2121_p1), %v2252_v44 }
 0x8d0   : > { %v1626_v12 = vpop.f32.mrb[44].mxu0  ;;  %v1667_v49 = vpop.f32.mrb[44].mxu1 }
 0x8d1   : > { %v1674_v50 = vadd.f32 %v1626_v12, %v3200_v57  ;;  %v1676_v51 = vadd.f32 %v1667_v49, %v3203_v61  ;;  %v1628_v62 = vpop.f32.mrb[45].mxu0  ;;  %v1669_v0 = vpop.f32.mrb[45].mxu1  ;;  %v1726_v12 = vld [vmem:[#allocation11 + $0x60] sm:$0xff] (!%p2121_p1)  ;;  %v1727_v49 = vld [vmem:[#allocation11 + $0x68] sm:$0xff] (!%p2121_p1) }
 0x8d2   : > { %v1675_v2 = vadd.f32 %v1628_v62, %v3205_v1  ;;  %v1677_v54 = vadd.f32 %v1669_v0, %v3208_v3  ;;  %v1630_v4 = vpop.f32.mrb[46].mxu0  ;;  %v1671_v56 = vpop.f32.mrb[46].mxu1  ;;  %v1825_v62 = vld [vmem:[#allocation13 + $0x58] sm:$0xff] (!%p2121_p1)  ;;  %v2260_v0 = vpack.c.bf16 (!%p2121_p1), %v1727_v49, %v1726_v12 }
 0x8d3   : > { %v2117_v58 = vmul.f32 -1.442695, %v1674_v50  ;;  %v1631_v19 = vpop.f32.mrb[47].mxu0  ;;  %v1672_v22 = vpop.f32.mrb[47].mxu1  ;;  %v2119_v59 = vmul.f32 -1.442695, %v1676_v51  ;;  %v2284_v50 = vpack.c.bf16 (!%p2121_p1), %v1823_v11, %v1822_v8 }
 0x8d4   : > { %v2118_v60 = vmul.f32 -1.442695, %v1675_v2  ;;  %v1824_v51 = vld [vmem:[#allocation13 + $0x50] sm:$0xff] (!%p2121_p1)  ;;  %v1826_v56 = vld [vmem:[#allocation13 + $0x60] sm:$0xff] (!%p2121_p1) }
 0x8d5   : > { %2525 = vpow2.f32 %v2117_v58  ;;  %v1728_v2 = vld [vmem:[#allocation11 + $0x70] sm:$0xff] (!%p2121_p1)  ;;  %2285 = vmatprep.subr.bf16.mxu1 (!%p2121_p1), %v2284_v50  ;;  %v2288_v4 = vpack.c.bf16 (!%p2121_p1), %v1825_v62, %v1824_v51  ;;  %v1827_v58 = vld [vmem:[#allocation13 + $0x68] sm:$0xff] (!%p2121_p1) }
 0x8d6   : > { %2527 = vpow2.f32 %v2118_v60  ;;  %2287 = vmatpush3.bf16.msra.mxu1 (!%p2121_p1), %v2284_v50  ;;  %v2292_v22 = vpack.c.bf16 (!%p2121_p1), %v1827_v58, %v1826_v56 }
 0x8d7   : > { %2529 = vtanh.f32 %v1677_v54  ;;  %v1729_v54 = vld [vmem:[#allocation11 + $0x78] sm:$0xff] (!%p2121_p1)  ;;  %2289 = vmatprep.subr.bf16.mxu1 (!%p2121_p1), %v2288_v4 }
 0x8d8   : > { %2531 = vpow2.f32 %v2119_v59  ;;  %v2264_v19 = vpack.c.bf16 (!%p2121_p1), %v1729_v54, %v1728_v2 }
 0x8da   : > { %2291 = vmatpush3.bf16.msra.mxu1 (!%p2121_p1), %v2288_v4 }
 0x8db   : > { %2293 = vmatprep.subr.bf16.mxu1 (!%p2121_p1), %v2292_v22 }
 0x8de   : > { %2295 = vmatpush3.bf16.msra.mxu1 (!%p2121_p1), %v2292_v22 }
 0x8df   : > { %v2526_v31 = vpop.eup %2525 }
 0x8e0   : > { %v1687_v33 = vadd.f32 1.0, %v2526_v31  ;;  %v2528_v57 = vpop.eup %2527  ;;  %v1828_v31 = vld [vmem:[#allocation13 + $0x70] sm:$0xff] (!%p2121_p1) }
 0x8e1   : > { %v1688_v61 = vadd.f32 1.0, %v2528_v57  ;;  %v2530_v1 = vpop.eup %2529 }
 0x8e2   : > { %2533 = vrcp.f32 %v1687_v33  ;;  %v2532_v3 = vpop.eup %2531  ;;  %v1829_v33 = vld [vmem:[#allocation13 + $0x78] sm:$0xff] (!%p2121_p1) }
 0x8e3   : > { %2535 = vrcp.f32 %v1688_v61  ;;  %v1689_v5 = vadd.f32 1.0, %v2532_v3  ;;  %v2296_v57 = vpack.c.bf16 (!%p2121_p1), %v1829_v33, %v1828_v31  ;;  %v2122_v61 = vld [vmem:[%s3411_s23] ss:$0 sm:$0xff] (!%p2121_p1) }
 0x8e5   : > { %2537 = vrcp.f32 %v1689_v5  ;;  %2297 = vmatprep.subr.bf16.mxu1 (!%p2121_p1), %v2296_v57 }
 0x8e6   : > { %2299 = vmatpush3.bf16.msra.mxu1 (!%p2121_p1), %v2296_v57 }
 0x8ec   : > { %v2534_v35 = vpop.eup %2533 }
 0x8ed   : > { %v1698_v63 = vmul.f32 %v2534_v35, %v2530_v1  ;;  %v2536_v36 = vpop.eup %2535 }
 0x8ee   : > { %v1697_v7 = vmul.f32 %v2536_v36, %v1580_v48  ;;  %v1725_v48 = vld [vmem:[#allocation11 + $0x58] sm:$0xff] (!%p2121_p1) }
 0x8ef   : > { %v2538_v16 = vpop.eup %2537  ;;  %v2256_v47 = vpack.c.bf16 (!%p2121_p1), %v1725_v48, %v1724_v46 }
 0x8f0   : > { %v1699_v9 = vadd.f32 %v1698_v63, %v1697_v7  ;;  %v2123_v7 = vld [vmem:[%s3412_s12] ss:$0 sm:$0xff] (!%p2121_p1) }
 0x8f1   : > { %2257 = vmatprep.subr.bf16.mxu0 (!%p2121_p1), %v2256_v47 }
 0x8f2   : > { %2539 = vtanh.f32 %v1699_v9  ;;  %2259 = vmatpush3.bf16.msra.mxu0 (!%p2121_p1), %v2256_v47 }
 0x8f3   : > { %2261 = vmatprep.subr.bf16.mxu0 (!%p2121_p1), %v2260_v0 }
 0x8f6   : > { %2263 = vmatpush3.bf16.msra.mxu0 (!%p2121_p1), %v2260_v0 }
 0x8f7   : > { %2265 = vmatprep.subr.bf16.mxu0 (!%p2121_p1), %v2264_v19 }
 0x8f9   : > { %1709 = sbr.rel (%p2121_p1) target bundleno = 2748 (0xabc), region = 80 }
 0x8fa   : > { %2267 = vmatpush3.bf16.msra.mxu0 (!%p2121_p1), %v2264_v19 }
 0x8fc   : > { %v2540_v14 = vpop.eup %2539 }
 0x8fd   : > { %v1701_v18 = vmul.f32 %v2540_v14, %v2538_v16 }
 0x8ff   : > { %1702 = vst [vmem:[#allocation2 + $0x38] sm:$0xff] %v1701_v18  ;;  %1705 = vst [vmem:[%s1704_s1] sm:$0xff] %v1701_v18 }
 0x906   : > { %v1710_v15 = vld [vmem:[#allocation4] sm:$0xff]  ;;  %v1711_v60 = vld [vmem:[#allocation4 + $0x8] sm:$0xff] }
 0x907   : > { %v1712_v17 = vmax.f32 %v1710_v15, 0.0  ;;  %v1713_v59 = vmax.f32 %v1711_v60, 0.0 }
 0x909   : > { %2198 = vmatprep.mubr.f32.mxu0 %v1712_v17 }
 0x90a   : > { %2199 = vmatmul.mubr.f32.vlgmr.msra.gmra.mrb[0].mxu0 %v1713_v59 }
 0x9dd   : > { %v2200_v1 = vpop.f32.mrb[0].mxu0 }
 0x9de   : > { %v1809_v3 = vadd.f32 %v2200_v1, %v2122_v61  ;;  %v1803_v35 = vpop.f32.mrb[1].mxu0 }
 0x9df   : > { %v1804_v63 = vadd.f32 %v2122_v61, %v1803_v35 }
 0x9e0   : > { %v1813_v5 = vmax.f32 %v1809_v3, 0.0 }
 0x9e1   : > { %v1812_v36 = vmax.f32 %v1804_v63, 0.0 }
 0x9e3   : > { %2233 = vmatprep.mubr.f32.mxu1 %v1812_v36 }
 0x9e4   : > { %2234 = vmatmul.mubr.f32.vlgmr.msra.gmra.mrb[0].mxu1 %v1813_v5 }
 0xab7   : > { %v2235_v9 = vpop.f32.mrb[0].mxu1 }
 0xab8   : > { %v1909_v16 = vadd.f32 %v2235_v9, %v2123_v7  ;;  %v1903_v14 = vpop.f32.mrb[1].mxu1 }
 0xab9   : > { %v1904_v18 = vadd.f32 %v2123_v7, %v1903_v14 }
 0xaba   : > { %1913 = vst [vmem:[#allocation14 + $0x8] sm:$0xff] %v1909_v16 }
 0xabb   : > { %1912 = vst [vmem:[#allocation14] sm:$0xff] %v1904_v18 }
 0xabc PF: > { %p2344_p10 = scmp.eq.s32.totalorder %s2836_s9, 1  ;;  %s2769_s25 = smov [#allocation14]  }
 0xabd   : > { %s1920_s16 = sshll.u32 %s2769_s25, 4  ;;  %s1921_s16 = int_to_ptr.vmem [resolvable:$true] %s1920_s16 }
 0xabe   : > { %s2685_s4 = scalar_lea.vmem %s1921_s16, 256  ;;  %p2692_p6 = scmp.lt.s32.totalorder %s1921_s16, %s1921_s16 }
 0xabf   : > { %p2686_p2 = scmp.ne.s32.totalorder %s1921_s16, %s2685_s4  ;;  %p2693_p11 = scmp.lt.s32.totalorder %s2685_s4, %s2685_s4 }
 0xac1   : > { %p2687_p4 = pnand %p2686_p2, %p2344_p10  ;;  %p2694_p9 = por %p2693_p11, %p2692_p6 }
 0xac3   : > { %p2688_p5 = pneg %p2687_p4 }
 0xac5   : > { %p2695_p12 = pnand %p2694_p9, %p2688_p5 }
 0xac7   : > { %2698 = shalt.err (!%p2695_p12)
}
 0xac8   : > { %s3413_s13 = sld [smem:[#allocation26_spill]] }
 0xace   : > { %s2699_s17 = scalar_lea.hbm %s3413_s13, 256 }
 0xacf   : > { %p2700_p0 = scmp.ne.s32.totalorder %s3413_s13, %s2699_s17  ;;  %p2705_p8 = scmp.lt.u32.totalorder %s2699_s17, %s3413_s13 }
 0xad1   : > { %p2701_p13 = pnand %p2700_p0, %p2344_p10 }
 0xad3   : > { %p2702_p3 = pneg %p2701_p13 }
 0xad5   : > { %p2707_p7 = pnand %p2705_p8, %p2702_p3 }
 0xad7   : > { %2710 = shalt.err (!%p2707_p7)
}
 0xad8   : > { %s2770_s11 = smov 128   ;;  %s2771_s18 = smov 8  }
 0xad9   : > { %2317 = dma.vmem_to_hbm [thread:$0]  (%p2344_p10), %s1921_s16, 256, %s3413_s13, [#allocation7], %s2770_s11, %s2770_s11, %s2771_s18  }
 0xada   : > { %2740 = dma.done.wait (%p2344_p10), [#allocation7], 256  }
 0xadb   : > { %2742 = vsyncadd (%p2344_p10), [#allocation7], 4294967040 }
 0xadc PF: > { %s3414_s30 = sld [smem:[#allocation20_spill]]  ;;  %s3415_s15 = sld [smem:[#allocation19_spill]] }
 0xadd   : > { %s3416_s29 = sld [smem:[#allocation21_spill]]  ;;  %s3417_s27 = smov %s2749_s28 }
 0xae2   : > { %p21_p1 = scmp.ge.s32.totalorder %s3414_s30, 4   ;;  %s3418_s28 = smov %s3415_s15 }
 0xae4   :  { %23 = sbr.rel (!%p21_p1) target bundleno = 12 (0xc), region = 125 }
 0xaeb   :  { %1936 = vsyncpa [#allocation6], 1 }
 0xaec   :  { %1938 = vsyncpa [#allocation6 + $0x1], 1 }
 0xaed   :  { %1939 = vsyncpa [#allocation9], 1 }
 0xaee   :  { %1941 = vsyncpa [#allocation9 + $0x1], 1 }
 0xaef   :  { %1942 = vsyncpa [#allocation12], 1 }
 0xaf0   :  { %1943 = vsyncpa [#allocation7], 1 }
 0xaf1   :  { %1945 = vsyncpa [#allocation7 + $0x1], 1 }

</bundles_post_ra>
